<compile_context>
chip_gen: v5e
topology: v5e:2x2
jax: 0.10.0
libtpu: 0.0.40
codegen_flags: <defaults>
</compile_context>

<pallas_src>
import functools
import math

import jax
import jax.numpy as jnp
from jax.experimental import pallas as pl
from jax.experimental.pallas import tpu as pltpu


def transformer_block_kernel(
    # inputs
    x_ref,                      # (1, S, E)   f32  full sequence for this batch
    g1_ref, beta1_ref,          # (1, E)      f32  layernorm1
    wqkv_ref, bqkv_ref,         # (E, 3E) bf16, (1, 3E) f32  fused q|k|v (scale folded into Q)
    wo_ref, bo_ref,             # (E, E) bf16, (1, E) f32    output projection
    g2_ref, beta2_ref,          # (1, E)      f32  layernorm2
    w1_ref, b1_ref,             # (E, F) bf16, (1, F) f32
    w2_ref, b2_ref,             # (F, E) bf16, (1, E) f32
    # output
    out_ref,                    # (1, S_TILE, E)
    # scratch (persists across the seq-tile grid axis)
    q_sc, k_sc, v_sc,           # (H, S, Hd) bf16
    *,
    num_heads: int,
    head_dim: int,
    s_tile: int,
    n_seq_tiles: int,
):
    f32, bf16 = jnp.float32, jnp.bfloat16
    eps = 1e-5
    E = x_ref.shape[2]
    qt = pl.program_id(1)

    def layer_norm(v, g, b):
        mu = jnp.mean(v, axis=-1, keepdims=True)
        var = jnp.mean(jnp.square(v - mu), axis=-1, keepdims=True)
        return (v - mu) * jax.lax.rsqrt(var + eps) * g + b

    # ---- once per batch (first seq tile): LN1 + fused QKV over the whole
    # sequence, CHUNKED so live intermediates stay (s_tile, 3E); head-split
    # Q/K/V cached in VMEM scratch (bf16, attention scale pre-folded into Q).
    @pl.when(qt == 0)
    def _project_qkv():
        @pl.loop(0, n_seq_tiles)
        def _(c):
            r0 = pl.multiple_of(c * s_tile, s_tile)
            xc = x_ref[0, pl.ds(r0, s_tile), :].astype(f32)            # (St, E)
            xn = layer_norm(xc, g1_ref[...], beta1_ref[...])
            qkv = (jnp.dot(xn.astype(bf16), wqkv_ref[...],
                           preferred_element_type=f32)
                   + bqkv_ref[...]).astype(bf16)                       # (St, 3E)
            for h in range(num_heads):   # static lane slices, once per batch
                lo = h * head_dim
                q_sc[h, pl.ds(r0, s_tile), :] = qkv[:, lo:lo + head_dim]
                k_sc[h, pl.ds(r0, s_tile), :] = qkv[:, E + lo:E + lo + head_dim]
                v_sc[h, pl.ds(r0, s_tile), :] = qkv[:, 2 * E + lo:2 * E + lo + head_dim]

    # ---- per seq tile: head-batched attention, f32 accumulation ----
    row0 = pl.multiple_of(qt * s_tile, s_tile)
    x_tile = x_ref[0, pl.ds(row0, s_tile), :].astype(f32)              # (St, E)

    q3 = q_sc[:, pl.ds(row0, s_tile), :]                               # (H, St, Hd) bf16
    s = jnp.einsum("hqd,hkd->hqk", q3, k_sc[...],
                   preferred_element_type=f32)                         # (H, St, S)
    s = s - jnp.max(s, axis=-1, keepdims=True)
    p = jnp.exp(s)                                                     # f32, <= 1
    denom = jnp.sum(p, axis=-1, keepdims=True)                         # (H, St, 1)
    ctx = jnp.einsum("hqk,hkd->hqd", p.astype(bf16), v_sc[...],
                     preferred_element_type=f32)                       # (H, St, Hd)
    # deferred softmax normalization on the small context tensor (EUP recip)
    ctx = ctx * pl.reciprocal(denom, approx=True)
    # lane-concatenate heads -> (St, E), then ONE full-depth output projection
    ctx2d = jnp.concatenate([ctx[h] for h in range(num_heads)],
                            axis=-1).astype(bf16)                      # (St, E)
    attn = jnp.dot(ctx2d, wo_ref[...],
                   preferred_element_type=f32) + bo_ref[...]           # (St, E)

    x1 = x_tile + attn                                                 # residual 1

    # ---- LayerNorm 2 + MLP (exact GELU for PyTorch parity) ----
    xn2 = layer_norm(x1, g2_ref[...], beta2_ref[...])
    h1 = jnp.dot(xn2.astype(bf16), w1_ref[...],
                 preferred_element_type=f32) + b1_ref[...]             # (St, F)
    h1 = 0.5 * h1 * (1.0 + jax.lax.erf(h1 * 0.7071067811865476))       # exact GELU
    h2 = jnp.dot(h1.astype(bf16), w2_ref[...],
                 preferred_element_type=f32) + b2_ref[...]             # (St, E)

    out_ref[0] = (x1 + h2).astype(out_ref.dtype)                       # residual 2


def _vmem_capacity_bytes():
    # narrow, documented fallback: the hardware query only (not the kernel build)
    try:
        return int(pltpu.get_tpu_info().vmem_capacity_bytes)
    except Exception:
        return 128 * 1024 * 1024


def transformer_block(x, params, *, num_heads, s_tile=None):
    B, S, E = x.shape
    F = params["w1"].shape[1]
    assert E % num_heads == 0, "embed_dim must be divisible by num_heads"
    head_dim = E // num_heads
    f32, bf16 = jnp.float32, jnp.bfloat16

    vmem_cap = _vmem_capacity_bytes()
    if s_tile is None:
        # bigger row blocks on 128-MiB parts (v5e/v6e); 128 on v7x (64 MiB)
        target = 256 if vmem_cap >= (100 << 20) else 128
        s_tile = next((t for t in (target, 128, 64, 32, 16, 8)
                       if t <= S and S % t == 0), S)
    assert S % s_tile == 0, "seq_len must be divisible by s_tile"
    assert s_tile == S or s_tile % 8 == 0
    n_seq_tiles = S // s_tile

    # ---- host-side one-time parameter prep: fused QKV weight with the
    # attention scale folded into the Q columns; bf16 weights, f32 biases/LN.
    scale = float(head_dim) ** -0.5
    wqkv = jnp.concatenate([params["wq"] * scale, params["wk"], params["wv"]],
                           axis=1).astype(bf16)                        # (E, 3E)
    bqkv = jnp.concatenate([params["bq"] * scale, params["bk"], params["bv"]],
                           axis=1).astype(f32)                         # (1, 3E)

    operands = (
        x,
        params["g1"].astype(f32), params["beta1"].astype(f32),
        wqkv, bqkv,
        params["wo"].astype(bf16), params["bo"].astype(f32),
        params["g2"].astype(f32), params["beta2"].astype(f32),
        params["w1"].astype(bf16), params["b1"].astype(f32),
        params["w2"].astype(bf16), params["b2"].astype(f32),
    )

    flops = int(2 * B * S * E * 3 * E          # fused qkv projection
                + 4 * B * S * S * E            # scores + context
                + 2 * B * S * E * E            # output projection
                + 4 * B * S * E * F)           # MLP
    transcendentals = int(B * (num_heads * S * S + S * F))
    bytes_accessed = int(2 * B * S * E * 4                 # x in / out (f32)
                         + 2 * (4 * E * E + 2 * E * F)     # bf16 weights
                         + 4 * (8 * E + F))                # biases / LN params

    kernel = functools.partial(
        transformer_block_kernel, num_heads=num_heads, head_dim=head_dim,
        s_tile=s_tile, n_seq_tiles=n_seq_tiles)

    # Constant-index weight/bias/LN operands: single VMEM buffer when this JAX
    # build supports pl.Buffered (feature-detected, so real compile errors are
    # never masked by a fallback that silently doubles weight VMEM).
    single_buffer = hasattr(pl, "Buffered")

    def const_spec(shape):
        kw = {"pipeline_mode": pl.Buffered(1)} if single_buffer else {}
        return pl.BlockSpec(shape, lambda b, q, _s=shape: (0,) * len(_s), **kw)

    in_specs = [
        # x: full sequence; block index depends only on b -> DMA'd once per batch
        pl.BlockSpec((1, S, E), lambda b, q: (b, 0, 0)),
        const_spec((1, E)), const_spec((1, E)),                # LN1
        const_spec((E, 3 * E)), const_spec((1, 3 * E)),        # fused QKV (scaled Q)
        const_spec((E, E)), const_spec((1, E)),                # output projection
        const_spec((1, E)), const_spec((1, E)),                # LN2
        const_spec((E, F)), const_spec((1, F)),                # MLP in
        const_spec((F, E)), const_spec((1, E)),                # MLP out
    ]

    # ~7/8 of physical VMEM, capped at 112 MiB: headroom on v7x (64 MiB
    # physical), most of the 128 MiB on v5e/v6e.
    vmem_limit = int(min((vmem_cap * 7) // 8, 112 * 1024 * 1024))

    return pl.pallas_call(
        kernel,
        out_shape=jax.ShapeDtypeStruct((B, S, E), x.dtype),
        grid=(B, n_seq_tiles),
        in_specs=in_specs,
        out_specs=pl.BlockSpec((1, s_tile, E), lambda b, q: (b, q, 0)),
        # (H, S, head_dim) bf16 scratch lane-pads only when head_dim < 128
        # (v7x VMEM-capacity concern); dense for head_dim >= 128.
        scratch_shapes=[pltpu.VMEM((num_heads, S, head_dim), bf16)] * 3,
        compiler_params=pltpu.CompilerParams(
            # batch axis -> megacore parallel; seq-tile axis carries the cached
            # K/V scratch, so it must stay sequential ("arbitrary").
            dimension_semantics=("parallel", "arbitrary"),
            vmem_limit_bytes=vmem_limit,
        ),
        cost_estimate=pl.CostEstimate(
            flops=flops, transcendentals=transcendentals,
            bytes_accessed=bytes_accessed),
    )(*operands)


def init_params(key, embed_dim, ff_dim):
    """PyTorch-default-style init. Linear weights stored as (in, out) so the
    math is y = x @ W + b (== torch's x @ W.T + b)."""
    keys = jax.random.split(key, 12)

    def linear(kw, kb, fan_in, fan_out):
        bound = 1.0 / math.sqrt(fan_in)
        w = jax.random.uniform(kw, (fan_in, fan_out), jnp.float32, -bound, bound)
        b = jax.random.uniform(kb, (1, fan_out), jnp.float32, -bound, bound)
        return w, b

    wq, bq = linear(keys[0], keys[1], embed_dim, embed_dim)
    wk, bk = linear(keys[2], keys[3], embed_dim, embed_dim)
    wv, bv = linear(keys[4], keys[5], embed_dim, embed_dim)
    wo, bo = linear(keys[6], keys[7], embed_dim, embed_dim)
    w1, b1 = linear(keys[8], keys[9], embed_dim, ff_dim)
    w2, b2 = linear(keys[10], keys[11], ff_dim, embed_dim)

    return dict(
        g1=jnp.ones((1, embed_dim), jnp.float32),
        beta1=jnp.zeros((1, embed_dim), jnp.float32),
        g2=jnp.ones((1, embed_dim), jnp.float32),
        beta2=jnp.zeros((1, embed_dim), jnp.float32),
        wq=wq, bq=bq, wk=wk, bk=bk, wv=wv, bv=bv, wo=wo, bo=bo,
        w1=w1, b1=b1, w2=w2, b2=b2,
    )


def _layer_norm_ref(v, g, b, eps=1e-5):
    mu = jnp.mean(v, axis=-1, keepdims=True)
    var = jnp.mean(jnp.square(v - mu), axis=-1, keepdims=True)
    return (v - mu) * jax.lax.rsqrt(var + eps) * g + b


def transformer_block_ref(x, p, *, num_heads):
    """Pure-JAX f32 reference matching the PyTorch module."""
    B, S, E = x.shape
    hd = E // num_heads
    xn1 = _layer_norm_ref(x, p["g1"], p["beta1"])
    q = xn1 @ p["wq"] + p["bq"]
    k = xn1 @ p["wk"] + p["bk"]
    v = xn1 @ p["wv"] + p["bv"]
    split = lambda t: t.reshape(B, S, num_heads, hd).transpose(0, 2, 1, 3)
    q, k, v = split(q), split(k), split(v)
    s = jnp.einsum("bhqd,bhkd->bhqk", q, k) * (hd ** -0.5)
    w = jax.nn.softmax(s, axis=-1)
    ctx = jnp.einsum("bhqk,bhkd->bhqd", w, v)
    ctx = ctx.transpose(0, 2, 1, 3).reshape(B, S, E)
    x1 = x + ctx @ p["wo"] + p["bo"]
    xn2 = _layer_norm_ref(x1, p["g2"], p["beta2"])
    h = xn2 @ p["w1"] + p["b1"]
    h = 0.5 * h * (1.0 + jax.lax.erf(h / math.sqrt(2.0)))
    return x1 + h @ p["w2"] + p["b2"]


if __name__ == "__main__":
    # small but lane-friendly shapes: batch=2, seq=16, embed=128 (4 heads of 32),
    # ff=256; the sequence is processed in tiles of 8 rows -> grid (2, 2).
    B, S, E, H, F = 2, 16, 128, 4, 256

    key = jax.random.PRNGKey(0)
    kx, kp = jax.random.split(key)
    x = jax.random.normal(kx, (B, S, E), jnp.float32)
    params = init_params(kp, E, F)

    out = jax.block_until_ready(
        transformer_block(x, params, num_heads=H, s_tile=8))
    assert out.shape == (B, S, E)
    assert bool(jnp.all(jnp.isfinite(out)))

    # parity with an f32 pure-JAX reference (tolerance covers bf16 weights /
    # activations and the approximate softmax reciprocal).
    ref = transformer_block_ref(x, params, num_heads=H)
    max_err = float(jnp.max(jnp.abs(out - ref)))
    assert max_err < 7.5e-2, f"kernel/reference mismatch: max abs err {max_err}"

    print("KERNEL_OK")
</pallas_src>

<mosaic_0001>
module attributes {stable_mosaic.version = 11 : i64} {
  func.func @transformer_block_kernel(%arg0: i32, %arg1: i32, %arg2: memref<1x16x128xf32, #tpu.memory_space<vmem>>, %arg3: memref<1x128xf32, #tpu.memory_space<vmem>>, %arg4: memref<1x128xf32, #tpu.memory_space<vmem>>, %arg5: memref<128x384xbf16, #tpu.memory_space<vmem>>, %arg6: memref<1x384xf32, #tpu.memory_space<vmem>>, %arg7: memref<128x128xbf16, #tpu.memory_space<vmem>>, %arg8: memref<1x128xf32, #tpu.memory_space<vmem>>, %arg9: memref<1x128xf32, #tpu.memory_space<vmem>>, %arg10: memref<1x128xf32, #tpu.memory_space<vmem>>, %arg11: memref<128x256xbf16, #tpu.memory_space<vmem>>, %arg12: memref<1x256xf32, #tpu.memory_space<vmem>>, %arg13: memref<256x128xbf16, #tpu.memory_space<vmem>>, %arg14: memref<1x128xf32, #tpu.memory_space<vmem>>, %arg15: memref<1x8x128xf32, #tpu.memory_space<vmem>>, %arg16: memref<4x16x32xbf16, #tpu.memory_space<vmem>>, %arg17: memref<4x16x32xbf16, #tpu.memory_space<vmem>>, %arg18: memref<4x16x32xbf16, #tpu.memory_space<vmem>>) attributes {dimension_semantics = [#tpu.dimension_semantics<parallel>, #tpu.dimension_semantics<arbitrary>], iteration_bounds = array<i64: 2, 2>, scalar_prefetch = 0 : i64, scratch_operands = 3 : i64, tpu.core_type = #tpu.core_type<tc>, window_params = [{transform_indices = @transform_0, window_bounds = array<i64: 1, 16, 128>}, {pipeline_mode = #tpu.pipeline_mode<synchronous>, transform_indices = @transform_1, window_bounds = array<i64: 1, 128>}, {pipeline_mode = #tpu.pipeline_mode<synchronous>, transform_indices = @transform_2, window_bounds = array<i64: 1, 128>}, {pipeline_mode = #tpu.pipeline_mode<synchronous>, transform_indices = @transform_3, window_bounds = array<i64: 128, 384>}, {pipeline_mode = #tpu.pipeline_mode<synchronous>, transform_indices = @transform_4, window_bounds = array<i64: 1, 384>}, {pipeline_mode = #tpu.pipeline_mode<synchronous>, transform_indices = @transform_5, window_bounds = array<i64: 128, 128>}, {pipeline_mode = #tpu.pipeline_mode<synchronous>, transform_indices = @transform_6, window_bounds = array<i64: 1, 128>}, {pipeline_mode = #tpu.pipeline_mode<synchronous>, transform_indices = @transform_7, window_bounds = array<i64: 1, 128>}, {pipeline_mode = #tpu.pipeline_mode<synchronous>, transform_indices = @transform_8, window_bounds = array<i64: 1, 128>}, {pipeline_mode = #tpu.pipeline_mode<synchronous>, transform_indices = @transform_9, window_bounds = array<i64: 128, 256>}, {pipeline_mode = #tpu.pipeline_mode<synchronous>, transform_indices = @transform_10, window_bounds = array<i64: 1, 256>}, {pipeline_mode = #tpu.pipeline_mode<synchronous>, transform_indices = @transform_11, window_bounds = array<i64: 256, 128>}, {pipeline_mode = #tpu.pipeline_mode<synchronous>, transform_indices = @transform_12, window_bounds = array<i64: 1, 128>}, {transform_indices = @transform_13, window_bounds = array<i64: 1, 8, 128>}]} {
    %c0_i32 = arith.constant 0 : i32
    %0 = arith.cmpi eq, %arg1, %c0_i32 : i32
    %1 = arith.extui %0 : i1 to i32
    %c0_i32_0 = arith.constant 0 : i32
    %2 = arith.cmpi ne, %1, %c0_i32_0 : i32
    scf.if %2 {
      %c0_i32_43 = arith.constant 0 : i32
      %c2_i32 = arith.constant 2 : i32
      %89 = arith.addi %c0_i32_43, %c2_i32 : i32
      %c1_i32 = arith.constant 1 : i32
      scf.for %arg19 = %c0_i32_43 to %89 step %c1_i32  : i32 {
        %c1_i32_45 = arith.constant 1 : i32
        %90 = arith.muli %arg19, %c1_i32_45 : i32
        %c0_i32_46 = arith.constant 0 : i32
        %91 = arith.addi %c0_i32_46, %90 : i32
        %c8_i32_47 = arith.constant 8 : i32
        %92 = arith.muli %91, %c8_i32_47 : i32
        %93 = tpu.assume_multiple %92, 8 : i32
        %c0_48 = arith.constant 0 : index
        %94 = arith.index_cast %93 : i32 to index
        %c0_49 = arith.constant 0 : index
        %95 = vector.load %arg2[%c0_48, %94, %c0_49] : memref<1x16x128xf32, #tpu.memory_space<vmem>>, vector<1x8x128xf32>
        %96 = vector.shape_cast %95 : vector<1x8x128xf32> to vector<8x128xf32>
        %c0_50 = arith.constant 0 : index
        %c0_51 = arith.constant 0 : index
        %97 = vector.load %arg3[%c0_50, %c0_51] : memref<1x128xf32, #tpu.memory_space<vmem>>, vector<1x128xf32>
        %c0_52 = arith.constant 0 : index
        %c0_53 = arith.constant 0 : index
        %98 = vector.load %arg4[%c0_52, %c0_53] : memref<1x128xf32, #tpu.memory_space<vmem>>, vector<1x128xf32>
        %cst_54 = arith.constant dense<0.000000e+00> : vector<8xf32>
        %99 = vector.multi_reduction <add>, %96, %cst_54 [1] : vector<8x128xf32> to vector<8xf32>
        %100 = vector.shape_cast %99 : vector<8xf32> to vector<8x1xf32>
        %cst_55 = arith.constant 1.280000e+02 : f32
        %101 = vector.broadcast %cst_55 : f32 to vector<8x1xf32>
        %102 = arith.divf %100, %101 : vector<8x1xf32>
        %103 = vector.broadcast %102 : vector<8x1xf32> to vector<8x128xf32>
        %104 = arith.subf %96, %103 : vector<8x128xf32>
        %105 = arith.mulf %104, %104 : vector<8x128xf32>
        %cst_56 = arith.constant dense<0.000000e+00> : vector<8xf32>
        %106 = vector.multi_reduction <add>, %105, %cst_56 [1] : vector<8x128xf32> to vector<8xf32>
        %107 = vector.shape_cast %106 : vector<8xf32> to vector<8x1xf32>
        %cst_57 = arith.constant 1.280000e+02 : f32
        %108 = vector.broadcast %cst_57 : f32 to vector<8x1xf32>
        %109 = arith.divf %107, %108 : vector<8x1xf32>
        %110 = vector.broadcast %102 : vector<8x1xf32> to vector<8x128xf32>
        %111 = arith.subf %96, %110 : vector<8x128xf32>
        %cst_58 = arith.constant 9.99999974E-6 : f32
        %112 = vector.broadcast %cst_58 : f32 to vector<8x1xf32>
        %113 = arith.addf %109, %112 : vector<8x1xf32>
        %114 = math.rsqrt %113 : vector<8x1xf32>
        %115 = vector.broadcast %114 : vector<8x1xf32> to vector<8x128xf32>
        %116 = arith.mulf %111, %115 : vector<8x128xf32>
        %117 = vector.broadcast %97 : vector<1x128xf32> to vector<8x128xf32>
        %118 = arith.mulf %116, %117 : vector<8x128xf32>
        %119 = vector.broadcast %98 : vector<1x128xf32> to vector<8x128xf32>
        %120 = arith.addf %118, %119 : vector<8x128xf32>
        %121 = arith.truncf %120 : vector<8x128xf32> to vector<8x128xbf16>
        %c0_59 = arith.constant 0 : index
        %c0_60 = arith.constant 0 : index
        %122 = vector.load %arg5[%c0_59, %c0_60] : memref<128x384xbf16, #tpu.memory_space<vmem>>, vector<128x384xbf16>
        %cst_61 = arith.constant dense<0.000000e+00> : vector<8x384xf32>
        %123 = tpu.matmul %121, %122, %cst_61 {dimension_numbers = #tpu.dot_dimension_numbers<[1], [0], [0], [1], [0, 0, 1, 1], [], []>} : vector<8x128xbf16>, vector<128x384xbf16>, vector<8x384xf32> -> vector<8x384xf32>
        %c0_62 = arith.constant 0 : index
        %c0_63 = arith.constant 0 : index
        %124 = vector.load %arg6[%c0_62, %c0_63] : memref<1x384xf32, #tpu.memory_space<vmem>>, vector<1x384xf32>
        %125 = vector.broadcast %124 : vector<1x384xf32> to vector<8x384xf32>
        %126 = arith.addf %123, %125 : vector<8x384xf32>
        %127 = arith.truncf %126 : vector<8x384xf32> to vector<8x384xbf16>
        %128 = vector.extract_strided_slice %127 {offsets = [0, 0], sizes = [8, 32], strides = [1, 1]} : vector<8x384xbf16> to vector<8x32xbf16>
        %c0_64 = arith.constant 0 : index
        %129 = arith.index_cast %93 : i32 to index
        %c0_65 = arith.constant 0 : index
        %130 = vector.load %arg16[%c0_64, %129, %c0_65] : memref<4x16x32xbf16, #tpu.memory_space<vmem>>, vector<1x8x32xbf16>
        %131 = vector.shape_cast %130 : vector<1x8x32xbf16> to vector<8x32xbf16>
        %132 = vector.shape_cast %128 : vector<8x32xbf16> to vector<1x8x32xbf16>
        tpu.vector_store %arg16[%c0_64, %129, %c0_65], %132 {strides = array<i32>} : memref<4x16x32xbf16, #tpu.memory_space<vmem>>, vector<1x8x32xbf16>,
        %133 = vector.extract_strided_slice %127 {offsets = [0, 128], sizes = [8, 32], strides = [1, 1]} : vector<8x384xbf16> to vector<8x32xbf16>
        %c0_66 = arith.constant 0 : index
        %134 = arith.index_cast %93 : i32 to index
        %c0_67 = arith.constant 0 : index
        %135 = vector.load %arg17[%c0_66, %134, %c0_67] : memref<4x16x32xbf16, #tpu.memory_space<vmem>>, vector<1x8x32xbf16>
        %136 = vector.shape_cast %135 : vector<1x8x32xbf16> to vector<8x32xbf16>
        %137 = vector.shape_cast %133 : vector<8x32xbf16> to vector<1x8x32xbf16>
        tpu.vector_store %arg17[%c0_66, %134, %c0_67], %137 {strides = array<i32>} : memref<4x16x32xbf16, #tpu.memory_space<vmem>>, vector<1x8x32xbf16>,
        %138 = vector.extract_strided_slice %127 {offsets = [0, 256], sizes = [8, 32], strides = [1, 1]} : vector<8x384xbf16> to vector<8x32xbf16>
        %c0_68 = arith.constant 0 : index
        %139 = arith.index_cast %93 : i32 to index
        %c0_69 = arith.constant 0 : index
        %140 = vector.load %arg18[%c0_68, %139, %c0_69] : memref<4x16x32xbf16, #tpu.memory_space<vmem>>, vector<1x8x32xbf16>
        %141 = vector.shape_cast %140 : vector<1x8x32xbf16> to vector<8x32xbf16>
        %142 = vector.shape_cast %138 : vector<8x32xbf16> to vector<1x8x32xbf16>
        tpu.vector_store %arg18[%c0_68, %139, %c0_69], %142 {strides = array<i32>} : memref<4x16x32xbf16, #tpu.memory_space<vmem>>, vector<1x8x32xbf16>,
        %143 = vector.extract_strided_slice %127 {offsets = [0, 32], sizes = [8, 32], strides = [1, 1]} : vector<8x384xbf16> to vector<8x32xbf16>
        %c1 = arith.constant 1 : index
        %144 = arith.index_cast %93 : i32 to index
        %c0_70 = arith.constant 0 : index
        %145 = vector.load %arg16[%c1, %144, %c0_70] : memref<4x16x32xbf16, #tpu.memory_space<vmem>>, vector<1x8x32xbf16>
        %146 = vector.shape_cast %145 : vector<1x8x32xbf16> to vector<8x32xbf16>
        %147 = vector.shape_cast %143 : vector<8x32xbf16> to vector<1x8x32xbf16>
        tpu.vector_store %arg16[%c1, %144, %c0_70], %147 {strides = array<i32>} : memref<4x16x32xbf16, #tpu.memory_space<vmem>>, vector<1x8x32xbf16>,
        %148 = vector.extract_strided_slice %127 {offsets = [0, 160], sizes = [8, 32], strides = [1, 1]} : vector<8x384xbf16> to vector<8x32xbf16>
        %c1_71 = arith.constant 1 : index
        %149 = arith.index_cast %93 : i32 to index
        %c0_72 = arith.constant 0 : index
        %150 = vector.load %arg17[%c1_71, %149, %c0_72] : memref<4x16x32xbf16, #tpu.memory_space<vmem>>, vector<1x8x32xbf16>
        %151 = vector.shape_cast %150 : vector<1x8x32xbf16> to vector<8x32xbf16>
        %152 = vector.shape_cast %148 : vector<8x32xbf16> to vector<1x8x32xbf16>
        tpu.vector_store %arg17[%c1_71, %149, %c0_72], %152 {strides = array<i32>} : memref<4x16x32xbf16, #tpu.memory_space<vmem>>, vector<1x8x32xbf16>,
        %153 = vector.extract_strided_slice %127 {offsets = [0, 288], sizes = [8, 32], strides = [1, 1]} : vector<8x384xbf16> to vector<8x32xbf16>
        %c1_73 = arith.constant 1 : index
        %154 = arith.index_cast %93 : i32 to index
        %c0_74 = arith.constant 0 : index
        %155 = vector.load %arg18[%c1_73, %154, %c0_74] : memref<4x16x32xbf16, #tpu.memory_space<vmem>>, vector<1x8x32xbf16>
        %156 = vector.shape_cast %155 : vector<1x8x32xbf16> to vector<8x32xbf16>
        %157 = vector.shape_cast %153 : vector<8x32xbf16> to vector<1x8x32xbf16>
        tpu.vector_store %arg18[%c1_73, %154, %c0_74], %157 {strides = array<i32>} : memref<4x16x32xbf16, #tpu.memory_space<vmem>>, vector<1x8x32xbf16>,
        %158 = vector.extract_strided_slice %127 {offsets = [0, 64], sizes = [8, 32], strides = [1, 1]} : vector<8x384xbf16> to vector<8x32xbf16>
        %c2 = arith.constant 2 : index
        %159 = arith.index_cast %93 : i32 to index
        %c0_75 = arith.constant 0 : index
        %160 = vector.load %arg16[%c2, %159, %c0_75] : memref<4x16x32xbf16, #tpu.memory_space<vmem>>, vector<1x8x32xbf16>
        %161 = vector.shape_cast %160 : vector<1x8x32xbf16> to vector<8x32xbf16>
        %162 = vector.shape_cast %158 : vector<8x32xbf16> to vector<1x8x32xbf16>
        tpu.vector_store %arg16[%c2, %159, %c0_75], %162 {strides = array<i32>} : memref<4x16x32xbf16, #tpu.memory_space<vmem>>, vector<1x8x32xbf16>,
        %163 = vector.extract_strided_slice %127 {offsets = [0, 192], sizes = [8, 32], strides = [1, 1]} : vector<8x384xbf16> to vector<8x32xbf16>
        %c2_76 = arith.constant 2 : index
        %164 = arith.index_cast %93 : i32 to index
        %c0_77 = arith.constant 0 : index
        %165 = vector.load %arg17[%c2_76, %164, %c0_77] : memref<4x16x32xbf16, #tpu.memory_space<vmem>>, vector<1x8x32xbf16>
        %166 = vector.shape_cast %165 : vector<1x8x32xbf16> to vector<8x32xbf16>
        %167 = vector.shape_cast %163 : vector<8x32xbf16> to vector<1x8x32xbf16>
        tpu.vector_store %arg17[%c2_76, %164, %c0_77], %167 {strides = array<i32>} : memref<4x16x32xbf16, #tpu.memory_space<vmem>>, vector<1x8x32xbf16>,
        %168 = vector.extract_strided_slice %127 {offsets = [0, 320], sizes = [8, 32], strides = [1, 1]} : vector<8x384xbf16> to vector<8x32xbf16>
        %c2_78 = arith.constant 2 : index
        %169 = arith.index_cast %93 : i32 to index
        %c0_79 = arith.constant 0 : index
        %170 = vector.load %arg18[%c2_78, %169, %c0_79] : memref<4x16x32xbf16, #tpu.memory_space<vmem>>, vector<1x8x32xbf16>
        %171 = vector.shape_cast %170 : vector<1x8x32xbf16> to vector<8x32xbf16>
        %172 = vector.shape_cast %168 : vector<8x32xbf16> to vector<1x8x32xbf16>
        tpu.vector_store %arg18[%c2_78, %169, %c0_79], %172 {strides = array<i32>} : memref<4x16x32xbf16, #tpu.memory_space<vmem>>, vector<1x8x32xbf16>,
        %173 = vector.extract_strided_slice %127 {offsets = [0, 96], sizes = [8, 32], strides = [1, 1]} : vector<8x384xbf16> to vector<8x32xbf16>
        %c3 = arith.constant 3 : index
        %174 = arith.index_cast %93 : i32 to index
        %c0_80 = arith.constant 0 : index
        %175 = vector.load %arg16[%c3, %174, %c0_80] : memref<4x16x32xbf16, #tpu.memory_space<vmem>>, vector<1x8x32xbf16>
        %176 = vector.shape_cast %175 : vector<1x8x32xbf16> to vector<8x32xbf16>
        %177 = vector.shape_cast %173 : vector<8x32xbf16> to vector<1x8x32xbf16>
        tpu.vector_store %arg16[%c3, %174, %c0_80], %177 {strides = array<i32>} : memref<4x16x32xbf16, #tpu.memory_space<vmem>>, vector<1x8x32xbf16>,
        %178 = vector.extract_strided_slice %127 {offsets = [0, 224], sizes = [8, 32], strides = [1, 1]} : vector<8x384xbf16> to vector<8x32xbf16>
        %c3_81 = arith.constant 3 : index
        %179 = arith.index_cast %93 : i32 to index
        %c0_82 = arith.constant 0 : index
        %180 = vector.load %arg17[%c3_81, %179, %c0_82] : memref<4x16x32xbf16, #tpu.memory_space<vmem>>, vector<1x8x32xbf16>
        %181 = vector.shape_cast %180 : vector<1x8x32xbf16> to vector<8x32xbf16>
        %182 = vector.shape_cast %178 : vector<8x32xbf16> to vector<1x8x32xbf16>
        tpu.vector_store %arg17[%c3_81, %179, %c0_82], %182 {strides = array<i32>} : memref<4x16x32xbf16, #tpu.memory_space<vmem>>, vector<1x8x32xbf16>,
        %183 = vector.extract_strided_slice %127 {offsets = [0, 352], sizes = [8, 32], strides = [1, 1]} : vector<8x384xbf16> to vector<8x32xbf16>
        %c3_83 = arith.constant 3 : index
        %184 = arith.index_cast %93 : i32 to index
        %c0_84 = arith.constant 0 : index
        %185 = vector.load %arg18[%c3_83, %184, %c0_84] : memref<4x16x32xbf16, #tpu.memory_space<vmem>>, vector<1x8x32xbf16>
        %186 = vector.shape_cast %185 : vector<1x8x32xbf16> to vector<8x32xbf16>
        %187 = vector.shape_cast %183 : vector<8x32xbf16> to vector<1x8x32xbf16>
        tpu.vector_store %arg18[%c3_83, %184, %c0_84], %187 {strides = array<i32>} : memref<4x16x32xbf16, #tpu.memory_space<vmem>>, vector<1x8x32xbf16>,
      }
      %c2_i32_44 = arith.constant 2 : i32
    } else {
    }
    %c8_i32 = arith.constant 8 : i32
    %3 = arith.muli %arg1, %c8_i32 : i32
    %4 = tpu.assume_multiple %3, 8 : i32
    %c0 = arith.constant 0 : index
    %5 = arith.index_cast %4 : i32 to index
    %c0_1 = arith.constant 0 : index
    %6 = vector.load %arg2[%c0, %5, %c0_1] : memref<1x16x128xf32, #tpu.memory_space<vmem>>, vector<1x8x128xf32>
    %7 = vector.shape_cast %6 : vector<1x8x128xf32> to vector<8x128xf32>
    %c0_2 = arith.constant 0 : index
    %8 = arith.index_cast %4 : i32 to index
    %c0_3 = arith.constant 0 : index
    %9 = vector.load %arg16[%c0_2, %8, %c0_3] : memref<4x16x32xbf16, #tpu.memory_space<vmem>>, vector<4x8x32xbf16>
    %c0_4 = arith.constant 0 : index
    %c0_5 = arith.constant 0 : index
    %c0_6 = arith.constant 0 : index
    %10 = vector.load %arg17[%c0_4, %c0_5, %c0_6] : memref<4x16x32xbf16, #tpu.memory_space<vmem>>, vector<4x16x32xbf16>
    "tpu.trace_start"() <{level = 10 : i32, message = "hqd,hkd->hqk"}> : () -> ()
    %cst = arith.constant dense<0.000000e+00> : vector<4x8x16xf32>
    %11 = tpu.matmul %9, %10, %cst {dimension_numbers = #tpu.dot_dimension_numbers<[2], [2], [1], [1], [0, 0, 0, 1, 1, 1], [0], [0]>} : vector<4x8x32xbf16>, vector<4x16x32xbf16>, vector<4x8x16xf32> -> vector<4x8x16xf32>
    "tpu.trace_stop"() : () -> ()
    %cst_7 = arith.constant dense<0xFF800000> : vector<4x8xf32>
    %12 = vector.multi_reduction <maximumf>, %11, %cst_7 [2] : vector<4x8x16xf32> to vector<4x8xf32>
    %13 = vector.shape_cast %12 : vector<4x8xf32> to vector<4x8x1xf32>
    %14 = vector.broadcast %13 : vector<4x8x1xf32> to vector<4x8x16xf32>
    %15 = arith.subf %11, %14 : vector<4x8x16xf32>
    %16 = math.exp %15 : vector<4x8x16xf32>
    %cst_8 = arith.constant dense<0.000000e+00> : vector<4x8xf32>
    %17 = vector.multi_reduction <add>, %16, %cst_8 [2] : vector<4x8x16xf32> to vector<4x8xf32>
    %18 = vector.shape_cast %17 : vector<4x8xf32> to vector<4x8x1xf32>
    %19 = arith.truncf %16 : vector<4x8x16xf32> to vector<4x8x16xbf16>
    %c0_9 = arith.constant 0 : index
    %c0_10 = arith.constant 0 : index
    %c0_11 = arith.constant 0 : index
    %20 = vector.load %arg18[%c0_9, %c0_10, %c0_11] : memref<4x16x32xbf16, #tpu.memory_space<vmem>>, vector<4x16x32xbf16>
    "tpu.trace_start"() <{level = 10 : i32, message = "hqk,hkd->hqd"}> : () -> ()
    %cst_12 = arith.constant dense<0.000000e+00> : vector<4x8x32xf32>
    %21 = tpu.matmul %19, %20, %cst_12 {dimension_numbers = #tpu.dot_dimension_numbers<[2], [1], [1], [2], [0, 0, 0, 1, 1, 2], [0], [0]>} : vector<4x8x16xbf16>, vector<4x16x32xbf16>, vector<4x8x32xf32> -> vector<4x8x32xf32>
    "tpu.trace_stop"() : () -> ()
    %22 = tpu.reciprocal %18 {approx = true} : vector<4x8x1xf32> -> vector<4x8x1xf32>
    %23 = vector.broadcast %22 : vector<4x8x1xf32> to vector<4x8x32xf32>
    %24 = arith.mulf %21, %23 : vector<4x8x32xf32>
    %25 = vector.extract_strided_slice %24 {offsets = [0, 0, 0], sizes = [1, 8, 32], strides = [1, 1, 1]} : vector<4x8x32xf32> to vector<1x8x32xf32>
    %26 = vector.shape_cast %25 : vector<1x8x32xf32> to vector<8x32xf32>
    %27 = vector.extract_strided_slice %24 {offsets = [1, 0, 0], sizes = [1, 8, 32], strides = [1, 1, 1]} : vector<4x8x32xf32> to vector<1x8x32xf32>
    %28 = vector.shape_cast %27 : vector<1x8x32xf32> to vector<8x32xf32>
    %29 = vector.extract_strided_slice %24 {offsets = [2, 0, 0], sizes = [1, 8, 32], strides = [1, 1, 1]} : vector<4x8x32xf32> to vector<1x8x32xf32>
    %30 = vector.shape_cast %29 : vector<1x8x32xf32> to vector<8x32xf32>
    %31 = vector.extract_strided_slice %24 {offsets = [3, 0, 0], sizes = [1, 8, 32], strides = [1, 1, 1]} : vector<4x8x32xf32> to vector<1x8x32xf32>
    %32 = vector.shape_cast %31 : vector<1x8x32xf32> to vector<8x32xf32>
    %33 = tpu.concatenate %26, %28, %30, %32 in 1 : vector<8x32xf32>, vector<8x32xf32>, vector<8x32xf32>, vector<8x32xf32> -> vector<8x128xf32>
    %34 = arith.truncf %33 : vector<8x128xf32> to vector<8x128xbf16>
    %c0_13 = arith.constant 0 : index
    %c0_14 = arith.constant 0 : index
    %35 = vector.load %arg7[%c0_13, %c0_14] : memref<128x128xbf16, #tpu.memory_space<vmem>>, vector<128x128xbf16>
    %cst_15 = arith.constant dense<0.000000e+00> : vector<8x128xf32>
    %36 = tpu.matmul %34, %35, %cst_15 {dimension_numbers = #tpu.dot_dimension_numbers<[1], [0], [0], [1], [0, 0, 1, 1], [], []>} : vector<8x128xbf16>, vector<128x128xbf16>, vector<8x128xf32> -> vector<8x128xf32>
    %c0_16 = arith.constant 0 : index
    %c0_17 = arith.constant 0 : index
    %37 = vector.load %arg8[%c0_16, %c0_17] : memref<1x128xf32, #tpu.memory_space<vmem>>, vector<1x128xf32>
    %38 = vector.broadcast %37 : vector<1x128xf32> to vector<8x128xf32>
    %39 = arith.addf %36, %38 : vector<8x128xf32>
    %40 = arith.addf %7, %39 : vector<8x128xf32>
    %c0_18 = arith.constant 0 : index
    %c0_19 = arith.constant 0 : index
    %41 = vector.load %arg9[%c0_18, %c0_19] : memref<1x128xf32, #tpu.memory_space<vmem>>, vector<1x128xf32>
    %c0_20 = arith.constant 0 : index
    %c0_21 = arith.constant 0 : index
    %42 = vector.load %arg10[%c0_20, %c0_21] : memref<1x128xf32, #tpu.memory_space<vmem>>, vector<1x128xf32>
    %cst_22 = arith.constant dense<0.000000e+00> : vector<8xf32>
    %43 = vector.multi_reduction <add>, %40, %cst_22 [1] : vector<8x128xf32> to vector<8xf32>
    %44 = vector.shape_cast %43 : vector<8xf32> to vector<8x1xf32>
    %cst_23 = arith.constant 1.280000e+02 : f32
    %45 = vector.broadcast %cst_23 : f32 to vector<8x1xf32>
    %46 = arith.divf %44, %45 : vector<8x1xf32>
    %47 = vector.broadcast %46 : vector<8x1xf32> to vector<8x128xf32>
    %48 = arith.subf %40, %47 : vector<8x128xf32>
    %49 = arith.mulf %48, %48 : vector<8x128xf32>
    %cst_24 = arith.constant dense<0.000000e+00> : vector<8xf32>
    %50 = vector.multi_reduction <add>, %49, %cst_24 [1] : vector<8x128xf32> to vector<8xf32>
    %51 = vector.shape_cast %50 : vector<8xf32> to vector<8x1xf32>
    %cst_25 = arith.constant 1.280000e+02 : f32
    %52 = vector.broadcast %cst_25 : f32 to vector<8x1xf32>
    %53 = arith.divf %51, %52 : vector<8x1xf32>
    %54 = vector.broadcast %46 : vector<8x1xf32> to vector<8x128xf32>
    %55 = arith.subf %40, %54 : vector<8x128xf32>
    %cst_26 = arith.constant 9.99999974E-6 : f32
    %56 = vector.broadcast %cst_26 : f32 to vector<8x1xf32>
    %57 = arith.addf %53, %56 : vector<8x1xf32>
    %58 = math.rsqrt %57 : vector<8x1xf32>
    %59 = vector.broadcast %58 : vector<8x1xf32> to vector<8x128xf32>
    %60 = arith.mulf %55, %59 : vector<8x128xf32>
    %61 = vector.broadcast %41 : vector<1x128xf32> to vector<8x128xf32>
    %62 = arith.mulf %60, %61 : vector<8x128xf32>
    %63 = vector.broadcast %42 : vector<1x128xf32> to vector<8x128xf32>
    %64 = arith.addf %62, %63 : vector<8x128xf32>
    %65 = arith.truncf %64 : vector<8x128xf32> to vector<8x128xbf16>
    %c0_27 = arith.constant 0 : index
    %c0_28 = arith.constant 0 : index
    %66 = vector.load %arg11[%c0_27, %c0_28] : memref<128x256xbf16, #tpu.memory_space<vmem>>, vector<128x256xbf16>
    %cst_29 = arith.constant dense<0.000000e+00> : vector<8x256xf32>
    %67 = tpu.matmul %65, %66, %cst_29 {dimension_numbers = #tpu.dot_dimension_numbers<[1], [0], [0], [1], [0, 0, 1, 1], [], []>} : vector<8x128xbf16>, vector<128x256xbf16>, vector<8x256xf32> -> vector<8x256xf32>
    %c0_30 = arith.constant 0 : index
    %c0_31 = arith.constant 0 : index
    %68 = vector.load %arg12[%c0_30, %c0_31] : memref<1x256xf32, #tpu.memory_space<vmem>>, vector<1x256xf32>
    %69 = vector.broadcast %68 : vector<1x256xf32> to vector<8x256xf32>
    %70 = arith.addf %67, %69 : vector<8x256xf32>
    %cst_32 = arith.constant 5.000000e-01 : f32
    %71 = vector.broadcast %cst_32 : f32 to vector<8x256xf32>
    %72 = arith.mulf %71, %70 : vector<8x256xf32>
    %cst_33 = arith.constant 0.707106769 : f32
    %73 = vector.broadcast %cst_33 : f32 to vector<8x256xf32>
    %74 = arith.mulf %70, %73 : vector<8x256xf32>
    %75 = math.erf %74 : vector<8x256xf32>
    %cst_34 = arith.constant 1.000000e+00 : f32
    %76 = vector.broadcast %cst_34 : f32 to vector<8x256xf32>
    %77 = arith.addf %76, %75 : vector<8x256xf32>
    %78 = arith.mulf %72, %77 : vector<8x256xf32>
    %79 = arith.truncf %78 : vector<8x256xf32> to vector<8x256xbf16>
    %c0_35 = arith.constant 0 : index
    %c0_36 = arith.constant 0 : index
    %80 = vector.load %arg13[%c0_35, %c0_36] : memref<256x128xbf16, #tpu.memory_space<vmem>>, vector<256x128xbf16>
    %cst_37 = arith.constant dense<0.000000e+00> : vector<8x128xf32>
    %81 = tpu.matmul %79, %80, %cst_37 {dimension_numbers = #tpu.dot_dimension_numbers<[1], [0], [0], [1], [0, 0, 1, 1], [], []>} : vector<8x256xbf16>, vector<256x128xbf16>, vector<8x128xf32> -> vector<8x128xf32>
    %c0_38 = arith.constant 0 : index
    %c0_39 = arith.constant 0 : index
    %82 = vector.load %arg14[%c0_38, %c0_39] : memref<1x128xf32, #tpu.memory_space<vmem>>, vector<1x128xf32>
    %83 = vector.broadcast %82 : vector<1x128xf32> to vector<8x128xf32>
    %84 = arith.addf %81, %83 : vector<8x128xf32>
    %85 = arith.addf %40, %84 : vector<8x128xf32>
    %c0_40 = arith.constant 0 : index
    %c0_41 = arith.constant 0 : index
    %c0_42 = arith.constant 0 : index
    %86 = vector.load %arg15[%c0_40, %c0_41, %c0_42] : memref<1x8x128xf32, #tpu.memory_space<vmem>>, vector<1x8x128xf32>
    %87 = vector.shape_cast %86 : vector<1x8x128xf32> to vector<8x128xf32>
    %88 = vector.shape_cast %85 : vector<8x128xf32> to vector<1x8x128xf32>
    tpu.vector_store %arg15[%c0_40, %c0_41, %c0_42], %88 {strides = array<i32>} : memref<1x8x128xf32, #tpu.memory_space<vmem>>, vector<1x8x128xf32>,
    return
  }
  func.func @transform_0(%arg0: i32, %arg1: i32) -> (i32, i32, i32) {
    %c0_i32 = arith.constant 0 : i32
    %c0_i32_0 = arith.constant 0 : i32
    %c0_i32_1 = arith.constant 0 : i32
    return %arg0, %c0_i32, %c0_i32_0 : i32, i32, i32
  }
  func.func @transform_1(%arg0: i32, %arg1: i32) -> (i32, i32) {
    %c0_i32 = arith.constant 0 : i32
    %c0_i32_0 = arith.constant 0 : i32
    %c0_i32_1 = arith.constant 0 : i32
    return %c0_i32, %c0_i32_0 : i32, i32
  }
  func.func @transform_2(%arg0: i32, %arg1: i32) -> (i32, i32) {
    %c0_i32 = arith.constant 0 : i32
    %c0_i32_0 = arith.constant 0 : i32
    %c0_i32_1 = arith.constant 0 : i32
    return %c0_i32, %c0_i32_0 : i32, i32
  }
  func.func @transform_3(%arg0: i32, %arg1: i32) -> (i32, i32) {
    %c0_i32 = arith.constant 0 : i32
    %c0_i32_0 = arith.constant 0 : i32
    %c0_i32_1 = arith.constant 0 : i32
    return %c0_i32, %c0_i32_0 : i32, i32
  }
  func.func @transform_4(%arg0: i32, %arg1: i32) -> (i32, i32) {
    %c0_i32 = arith.constant 0 : i32
    %c0_i32_0 = arith.constant 0 : i32
    %c0_i32_1 = arith.constant 0 : i32
    return %c0_i32, %c0_i32_0 : i32, i32
  }
  func.func @transform_5(%arg0: i32, %arg1: i32) -> (i32, i32) {
    %c0_i32 = arith.constant 0 : i32
    %c0_i32_0 = arith.constant 0 : i32
    %c0_i32_1 = arith.constant 0 : i32
    return %c0_i32, %c0_i32_0 : i32, i32
  }
  func.func @transform_6(%arg0: i32, %arg1: i32) -> (i32, i32) {
    %c0_i32 = arith.constant 0 : i32
    %c0_i32_0 = arith.constant 0 : i32
    %c0_i32_1 = arith.constant 0 : i32
    return %c0_i32, %c0_i32_0 : i32, i32
  }
  func.func @transform_7(%arg0: i32, %arg1: i32) -> (i32, i32) {
    %c0_i32 = arith.constant 0 : i32
    %c0_i32_0 = arith.constant 0 : i32
    %c0_i32_1 = arith.constant 0 : i32
    return %c0_i32, %c0_i32_0 : i32, i32
  }
  func.func @transform_8(%arg0: i32, %arg1: i32) -> (i32, i32) {
    %c0_i32 = arith.constant 0 : i32
    %c0_i32_0 = arith.constant 0 : i32
    %c0_i32_1 = arith.constant 0 : i32
    return %c0_i32, %c0_i32_0 : i32, i32
  }
  func.func @transform_9(%arg0: i32, %arg1: i32) -> (i32, i32) {
    %c0_i32 = arith.constant 0 : i32
    %c0_i32_0 = arith.constant 0 : i32
    %c0_i32_1 = arith.constant 0 : i32
    return %c0_i32, %c0_i32_0 : i32, i32
  }
  func.func @transform_10(%arg0: i32, %arg1: i32) -> (i32, i32) {
    %c0_i32 = arith.constant 0 : i32
    %c0_i32_0 = arith.constant 0 : i32
    %c0_i32_1 = arith.constant 0 : i32
    return %c0_i32, %c0_i32_0 : i32, i32
  }
  func.func @transform_11(%arg0: i32, %arg1: i32) -> (i32, i32) {
    %c0_i32 = arith.constant 0 : i32
    %c0_i32_0 = arith.constant 0 : i32
    %c0_i32_1 = arith.constant 0 : i32
    return %c0_i32, %c0_i32_0 : i32, i32
  }
  func.func @transform_12(%arg0: i32, %arg1: i32) -> (i32, i32) {
    %c0_i32 = arith.constant 0 : i32
    %c0_i32_0 = arith.constant 0 : i32
    %c0_i32_1 = arith.constant 0 : i32
    return %c0_i32, %c0_i32_0 : i32, i32
  }
  func.func @transform_13(%arg0: i32, %arg1: i32) -> (i32, i32, i32) {
    %c0_i32 = arith.constant 0 : i32
    %c0_i32_0 = arith.constant 0 : i32
    return %arg0, %arg1, %c0_i32 : i32, i32, i32
  }
}

</mosaic_0001>

<bundles_post_ra>
// kernel: tpu_custom_call.1
= control target key start
LH: loop header
LB: loop body
LE: loop exit
PB: predicated region body
PF: predicated region fallthrough
CT: control target
= control target key end

     0   :  { %s3432_s0 = inlined_call_operand.hbm [shape: f32[2,16,128], index: 0, kind: input, shape index: {}]   ;;  %s3433_s1 = inlined_call_operand.hbm [shape: f32[1,128], index: 1, kind: input, shape index: {}]   ;;  %s3434_s2 = inlined_call_operand.hbm [shape: f32[1,128], index: 2, kind: input, shape index: {}]   ;;  %s3435_s3 = inlined_call_operand.hbm [shape: bf16[128,384], index: 3, kind: input, shape index: {}]   ;;  %s3436_s4 = inlined_call_operand.vmem [shape: f32[1,384], index: 4, kind: input, shape index: {}]   ;;  %s3437_s5 = inlined_call_operand.hbm [shape: bf16[128,128], index: 5, kind: input, shape index: {}]   ;;  %s3438_s6 = inlined_call_operand.hbm [shape: f32[1,128], index: 6, kind: input, shape index: {}]   ;;  %s3439_s7 = inlined_call_operand.vmem [shape: f32[1,128], index: 7, kind: input, shape index: {}]   ;;  %s3440_s8 = inlined_call_operand.vmem [shape: f32[1,128], index: 8, kind: input, shape index: {}]   ;;  %s3441_s9 = inlined_call_operand.hbm [shape: bf16[128,256], index: 9, kind: input, shape index: {}]   ;;  %s3442_s10 = inlined_call_operand.vmem [shape: f32[1,256], index: 10, kind: input, shape index: {}]   ;;  %s3443_s11 = inlined_call_operand.hbm [shape: bf16[256,128], index: 11, kind: input, shape index: {}]   ;;  %s3444_s12 = inlined_call_operand.vmem [shape: f32[1,128], index: 12, kind: input, shape index: {}]   ;;  %s3445_s13 = inlined_call_operand.hbm [shape: f32[2,16,128], index: 13, kind: output, shape index: {}]  }
   0x1   :  { %3453 = sst [smem:[#allocation30_spill]] %s3432_s0 }
   0x2   :  { %3454 = sst [smem:[#allocation31_spill]] %s3433_s1 }
   0x3   :  { %3455 = sst [smem:[#allocation32_spill]] %s3434_s2 }
   0x4   :  { %3456 = sst [smem:[#allocation33_spill]] %s3435_s3 }
   0x5   :  { %3457 = sst [smem:[#allocation34_spill]] %s3436_s4 }
   0x6   :  { %3458 = sst [smem:[#allocation35_spill]] %s3437_s5 }
   0x7   :  { %3459 = sst [smem:[#allocation36_spill]] %s3438_s6 }
   0x8   :  { %3460 = sst [smem:[#allocation37_spill]] %s3439_s7 }
   0x9   :  { %3461 = sst [smem:[#allocation38_spill]] %s3440_s8 }
   0xa   :  { %3462 = sst [smem:[#allocation39_spill]] %s3441_s9 }
   0xb   :  { %3463 = sst [smem:[#allocation40_spill]] %s3442_s10 }
   0xc   :  { %3464 = sst [smem:[#allocation41_spill]] %s3443_s11 }
   0xd   :  { %3465 = sst [smem:[#allocation42_spill]] %s3444_s12 }
   0xe   :  { %3466 = sst [smem:[#allocation43_spill]] %s3445_s13 }
   0xf   :  { %18 = vsyncpa [#allocation6], 0 }
  0x10   :  { %20 = vsyncpa [#allocation6 + $0x1], 0 }
  0x11   :  { %21 = vsyncpa [#allocation9], 0 }
  0x12   :  { %22 = vsyncpa [#allocation12], 0 }
  0x13   :  { %23 = vsyncpa [#allocation15], 0 }
  0x14   :  { %24 = vsyncpa [#allocation18], 0 }
  0x15   :  { %25 = vsyncpa [#allocation7], 0 }
  0x16   :  { %27 = vsyncpa [#allocation7 + $0x1], 0  ;;  %s3038_s25 = smov 0   ;;  %s3040_s26 = smov 0  }
  0x17   :  { %s3042_s27 = smov 0   ;;  %s3044_s28 = smov 0  }
  0x18   :  { %s3046_s29 = smov 0   ;;  %s3048_s30 = smov 0  }
  0x19   :  { %s3050_s14 = smov 0   ;;  %s3052_s15 = smov 0  }
  0x1a   :  { %s3054_s16 = smov 0   ;;  %s3056_s17 = smov 0  }
  0x1b   :  { %s3058_s18 = smov 0  }
  0x1c LB: > { %3467 = sst [smem:[#allocation26_spill]] %s2925_s14  ;;  %s3447_s19 = sadd.s32 4294967295, %s2941_s18   ;;  %s2941_s18 = sphi %s3058_s18, %s33_s18   ;;  %s2937_s17 = sphi %s3056_s17, %s3510_s17   ;;  %s2933_s16 = sphi %s3054_s16, %s3509_s16   ;;  %s2929_s15 = sphi %s3052_s15, %s3508_s15   ;;  %s2925_s14 = sphi %s3050_s14, %s3507_s14   ;;  %s2921_s30 = sphi %s3048_s30, %s3506_s30   ;;  %s2917_s29 = sphi %s3046_s29, %s3505_s29   ;;  %s2913_s28 = sphi %s3044_s28, %s3504_s28   ;;  %s2909_s27 = sphi %s3042_s27, %s3503_s27   ;;  %s2905_s26 = sphi %s3040_s26, %s3502_s26   ;;  %s2901_s25 = sphi %s3038_s25, %s3501_s25  }
  0x1d   : > { %3468 = sst [smem:[#allocation27_spill]] %s2929_s15  ;;  %p1907_p0 = scmp.ge.s32.totalorder %s2941_s18, 1 }
  0x1e   : > { %p3097_p1 = scmp.eq.s32.totalorder %s3447_s19, 0  ;;  %p356_p2 = scmp.lt.s32.totalorder %s2941_s18, 5 }
  0x1f   : > { %s3470_s1 = sld [smem:[#allocation31_spill]]  ;;  %s2947_s13 = smov [#allocation8]  }
  0x20   : > { %p3105_p3 = pnand %p1907_p0, %p356_p2  ;;  %s370_s12 = sshll.u32 %s2947_s13, 4  ;;  %s371_s12 = int_to_ptr.vmem [resolvable:$true] %s370_s12 }
  0x21   : > { %s3473_s3 = sld [smem:[#allocation33_spill]]  ;;  %s2948_s21 = smov [#allocation11]  }
  0x22   : > { %s3471_s24 = scalar_select %p3105_p3, 1, 0 }
  0x23   : > { %p2362_p4 = pneg %p3105_p3  ;;  %s393_s22 = sshll.u32 %s2948_s21, 4  ;;  %s394_s22 = int_to_ptr.vmem [resolvable:$true] %s393_s22 }
  0x24   : > { %3472 = sst [smem:[#allocation28_spill]] %s3471_s24  ;;  %s2949_s13 = smov 192  }
  0x25   : > { %s368_s23 = sshll.u32 %s3470_s1, 4  ;;  %p3116_p5 = pnand %p2362_p4, %p3097_p1  ;;  %s369_s23 = int_to_ptr.hbm [resolvable:$true] %s368_s23 }
  0x26   : > { %s2950_s1 = smov 12   ;;  %s3475_s6 = sld [smem:[#allocation36_spill]] }
  0x27   : > { %s391_s10 = sshll.u32 %s3473_s3, 4  ;;  %s2951_s7 = smov [#allocation14]   ;;  %s392_s10 = int_to_ptr.hbm [resolvable:$true] %s391_s10 }
  0x28   : > { %2365 = dma.hbm_to_vmem [thread:$0]  (!%p3116_p5), %s369_s23, 16, %s371_s12, [#allocation9]  }
  0x29   : > { %2371 = dma.hbm_to_vmem [thread:$0]  (!%p3116_p5), %s392_s10, 3072, %s394_s22, [#allocation12], %s2949_s13, %s2949_s13, %s2950_s1  }
  0x2a   : > { %s425_s4 = sshll.u32 %s2951_s7, 4  ;;  %s3476_s2 = sld [smem:[#allocation32_spill]]  ;;  %s426_s4 = int_to_ptr.vmem [resolvable:$true] %s425_s4 }
  0x2b   : > { %s2952_s12 = smov [#allocation10]   ;;  %s3477_s5 = sld [smem:[#allocation35_spill]] }
  0x2c   : > { %s423_s3 = sshll.u32 %s3475_s6, 4  ;;  %s382_s23 = sshll.u32 %s2952_s12, 4  ;;  %s424_s3 = int_to_ptr.hbm [resolvable:$true] %s423_s3  ;;  %s383_s23 = int_to_ptr.vmem [resolvable:$true] %s382_s23 }
  0x2d   : > { %2377 = dma.hbm_to_vmem [thread:$0]  (!%p3116_p5), %s424_s3, 16, %s426_s4, [#allocation15]  }
  0x2e   : > { %s2953_s7 = smov [#allocation13]   ;;  %s3478_s9 = sld [smem:[#allocation39_spill]] }
  0x2f   : > { %s410_s22 = sshll.u32 %s2953_s7, 4  ;;  %s2954_s3 = smov 64   ;;  %s411_s22 = int_to_ptr.vmem [resolvable:$true] %s410_s22 }
  0x30   : > { %s380_s21 = sshll.u32 %s3476_s2, 4  ;;  %s2955_s4 = smov 4   ;;  %s381_s21 = int_to_ptr.hbm [resolvable:$true] %s380_s21 }
  0x31   : > { %s408_s10 = sshll.u32 %s3477_s5, 4  ;;  %s2956_s0 = smov [#allocation16]   ;;  %s409_s10 = int_to_ptr.hbm [resolvable:$true] %s408_s10 }
  0x32   : > { %2368 = dma.hbm_to_vmem [thread:$0]  (!%p3116_p5), %s381_s21, 16, %s383_s23, [#allocation9]  }
  0x33   : > { %2374 = dma.hbm_to_vmem [thread:$0]  (!%p3116_p5), %s409_s10, 1024, %s411_s22, [#allocation12], %s2954_s3, %s2954_s3, %s2955_s4  }
  0x34   : > { %s440_s13 = sshll.u32 %s3478_s9, 4  ;;  %s442_s15 = sshll.u32 %s2956_s0, 4  ;;  %s441_s13 = int_to_ptr.hbm [resolvable:$true] %s440_s13  ;;  %s443_s15 = int_to_ptr.vmem [resolvable:$true] %s442_s15 }
  0x35   : > { %s3450_s19 = smov 128   ;;  %s3451_s21 = smov 8  }
  0x36   : > { %2380 = dma.hbm_to_vmem [thread:$0]  (!%p3116_p5), %s441_s13, 2048, %s443_s15, [#allocation15], %s3450_s19, %s3450_s19, %s3451_s21  }
  0x37   : > { %s3479_s11 = sld [smem:[#allocation41_spill]]  ;;  %s2959_s10 = smov [#allocation17]  }
  0x38   : > { %s459_s7 = sshll.u32 %s2959_s10, 4  ;;  %s1906_s22 = sadd.s32 4294967294, %s2941_s18   ;;  %s460_s7 = int_to_ptr.vmem [resolvable:$true] %s459_s7 }
  0x39   : > { %s42_s14 = sadd.s32 1, %s2933_s16  ;;  %s45_s24 = sadd.s32 1, %s2937_s17 }
  0x3a   : > { %p43_p6 = scmp.ge.s32.totalorder %s42_s14, 2  ;;  %s52_s13 = sadd.s32 1, %s2921_s30 }
  0x3b   : > { %p59_p7 = scmp.ne.s32.totalorder %s2921_s30, %s2917_s29  ;;  %p60_p8 = scmp.eq.s32.totalorder %s2941_s18, 0 }
  0x3c   : > { %s3512_s14 = smov (%p43_p6, %s42_s14), 0  ;;  %s3514_s24 = smov (!%p43_p6, %s45_s24), %s2937_s17 }
  0x3d   : > { %s457_s1 = sshll.u32 %s3479_s11, 4  ;;  %p3162_p9 = por %p60_p8, %p59_p7  ;;  %s458_s1 = int_to_ptr.hbm [resolvable:$true] %s457_s1 }
  0x3e   : > { %2383 = dma.hbm_to_vmem [thread:$0]  (!%p3116_p5), %s458_s1, 2048, %s460_s7, [#allocation18], %s2954_s3, %s2954_s3, %s2955_s4  }
  0x3f   : > { %p65_p10 = scmp.ne.s32.totalorder %s2917_s29, %s2913_s28  ;;  %p47_p11 = scmp.ge.s32.totalorder %s3514_s24, 2 }
  0x40   : > { %s328_s3 = ssub.s32 %s2933_s16, %s3512_s14  ;;  %s332_s0 = sadd.s32 1, %s2909_s27 }
  0x41   : > { %p3172_p12 = por %p3097_p1, %p65_p10  ;;  %s3516_s24 = smov (%p47_p11, %s3514_s24), 0 }
  0x42   : > { %3482 = sst [smem:[#allocation29_spill]] %s3516_s24  ;;  %p342_p13 = scmp.ne.s32.totalorder %s2909_s27, %s2905_s26 }
  0x43   : > { %s3483_s15 = sadd.s32 4294967295, %s2941_s18   ;;  %s49_s12 = ssub.s32 %s2937_s17, %s3516_s24 }
  0x44   : > { %p343_p0 = scmp.eq.s32.totalorder %s3483_s15, 3  ;;  %p348_p2 = scmp.ne.s32.totalorder %s2905_s26, %s2901_s25 }
  0x45   : > { %p50_p4 = scmp.eq.s32.totalorder %s49_s12, 0  ;;  %s329_s28 = sor.u32 %s328_s3, %s49_s12 }
  0x46   : > { %p330_p5 = scmp.eq.s32.totalorder %s329_s28, 0  ;;  %p3187_p6 = por %p343_p0, %p342_p13 }
  0x47   : > { %s3192_s1 = scalar_select %p50_p4, %s2921_s30, %s52_s13  }
  0x48   : > { %s3195_s10 = scalar_select %p330_p5, %s2909_s27, %s332_s0  }
  0x49   : > { %p349_p7 = scmp.eq.s32.totalorder %s1906_s22, 3  ;;  %p2399_p8 = scmp.lt.s32.totalorder %s2941_s18, 4 }
  0x4a   : > { %s476_s7 = sand.u32 1, %s2921_s30   ;;  %s2257_s19 = sshll.u32 %s2937_s17, 4 }
  0x4b   : > { %p3200_p10 = por %p349_p7, %p348_p2  ;;  %s1916_s21 = sshll.u32 %s476_s7, 4 }
  0x4c   : > { %s3486_s28 = sld [smem:[#allocation30_spill]]  ;;  %s480_s6 = scalar_lea.vmem [#allocation5], %s1916_s21 }
  0x4d   : > { %s488_s13 = sshll.u32 %s480_s6, 4  ;;  %p2385_p11 = pnand %p2399_p8, %p3162_p9  ;;  %s489_s13 = int_to_ptr.vmem [resolvable:$true] %s488_s13 }
  0x4e   : > { %s477_s22 = scalar_lea.sflag [#allocation6], %s476_s7  ;;  %s3487_s0 = smov 8  }
  0x4f   : > { %s3488_s9 = smov 128   ;;  %s502_s24 = sand.u32 (!%p3105_p3), 1, %s2917_s29  }
  0x50   : > { %500 = sbr.rel (%p3105_p3) target bundleno = 1895 (0x767), region = 72  ;;  %s3215_s3 = sshll.u32 (!%p3105_p3), %s502_s24, 4 }
  0x52   : > { %s485_s2 = scalar_lea.hbm %s3486_s28, %s2257_s19  ;;  %s506_s19 = scalar_lea.vmem (!%p3105_p3), [#allocation5], %s3215_s3 }
  0x53   : > { %s486_s5 = sshll.u32 %s485_s2, 4  ;;  %s503_s2 = scalar_lea.sflag (!%p3105_p3), [#allocation6], %s502_s24  ;;  %s487_s5 = int_to_ptr.hbm [resolvable:$true] %s486_s5 }
  0x54   : > { %2387 = dma.hbm_to_vmem [thread:$0]  (!%p2385_p11), %s487_s5, 256, %s489_s13, %s477_s22, %s3488_s9, %s3488_s9, %s3487_s0  }
  0x55   : > { %2876 = dma.done.wait (%p3172_p12), %s503_s2, 256  }
  0x56   : > { %2878 = vsyncadd (%p3172_p12), %s503_s2, 4294967040 }
  0x57   : > { %2880 = dma.done.wait (%p3097_p1), [#allocation9], 32  }
  0x58   : > { %2882 = vsyncadd (%p3097_p1), [#allocation9], 4294967264 }
  0x59   : > { %2884 = dma.done.wait (%p3097_p1), [#allocation12], 4096  }
  0x5a   : > { %2886 = vsyncadd (%p3097_p1), [#allocation12], 4294963200 }
  0x5b   : > { %2888 = dma.done.wait (%p3097_p1), [#allocation15], 2064  }
  0x5c   : > { %2890 = vsyncadd (%p3097_p1), [#allocation15], 4294965232 }
  0x5d   : > { %2892 = dma.done.wait (%p3097_p1), [#allocation18], 2048  }
  0x5e   : > { %2894 = vsyncadd (%p3097_p1), [#allocation18], 4294965248  ;;  %s582_s5 = sand.u32 1, %s2905_s26   ;;  %s3490_s11 = sld [smem:[#allocation26_spill]] }
  0x5f   : > { %s3241_s6 = sshll.u32 %s582_s5, 3 }
  0x60   : > { %s584_s9 = scalar_lea.vmem [#allocation19], %s3241_s6 }
  0x64   : > { %p1929_p3 = scmp.ne.s32.totalorder %s3490_s11, 0 }
  0x65   : > { %s3245_s21 = smov (!%p1929_p3), 0  }
  0x66   : > { %589 = sbr.rel (%p1929_p3) target bundleno = 640 (0x280), region = 108 }
  0x6b LB: >> { %s1930_s20 = sshll.u32 %s2945_s21, 3  ;;  %v2960_v1 = vmov 128.0   ;;  %v2017_v2 = vld [vmem:[#allocation11 + $0xa8] sm:$0xf]  ;;  %v2280_v3 = vld [vmem:[#allocation11 + $0xb0] sm:$0xf0]  ;;  %s2945_s21 = sphi %s3245_s21, %s595_s21  }
  0x6c   : >> { %s597_s24 = scalar_lea.vmem %s506_s19, %s1930_s20 [#allocation5]  ;;  %2527 = vrcp.f32 %v2960_v1  ;;  %v2279_v4 = vld [vmem:[#allocation11 + $0xac] sm:$0xf]  ;;  %v2018_v5 = vor.u32 %v2280_v3, %v2017_v2  ;;  %v2019_v6 = vld [vmem:[#allocation11 + $0xb4] sm:$0xf0]  ;;  %v2025_v7 = vld [vmem:[#allocation11 + $0xb0] sm:$0xf] }
  0x6d   : >> { %v598_v0 = vld [vmem:[%s597_s24] sm:$0xff]  ;;  %v2022_v9 = vor.u32 %v2279_v4, %v2019_v6  ;;  %v2005_v21 = vld [vmem:[#allocation11 + $0x90] sm:$0xf]  ;;  %v2276_v23 = vld [vmem:[#allocation11 + $0x94] sm:$0xf]  ;;  %s3491_s7 = sld [smem:[#allocation34_spill]] }
  0x6e   : >> { %601 = vadd.xlane.f32.xlu0 %v598_v0  ;;  %v2281_v8 = vld [vmem:[#allocation11 + $0xb8] sm:$0xf0]  ;;  %805 = vmatpush.bf16.msra.mxu0 %v2018_v5  ;;  %v2007_v25 = vld [vmem:[#allocation11 + $0x9c] sm:$0xf0]  ;;  %v2013_v26 = vld [vmem:[#allocation11 + $0x98] sm:$0xf] }
  0x6f   : >> { %v2026_v10 = vor.u32 %v2281_v8, %v2025_v7  ;;  %818 = vmatpush.bf16.msra.mxu1 %v2022_v9  ;;  %v2277_v22 = vld [vmem:[#allocation11 + $0x98] sm:$0xf0]  ;;  %v2278_v27 = vld [vmem:[#allocation11 + $0xa0] sm:$0xf0]  ;;  %v2010_v28 = vor.u32 %v2276_v23, %v2007_v25  ;;  %v1993_v30 = vld [vmem:[#allocation11 + $0x78] sm:$0xf] }
  0x70   : >> { %v2006_v24 = vor.u32 %v2277_v22, %v2005_v21  ;;  %v2014_v29 = vor.u32 %v2278_v27, %v2013_v26  ;;  %v2274_v31 = vld [vmem:[#allocation11 + $0x80] sm:$0xf0]  ;;  %v2273_v32 = vld [vmem:[#allocation11 + $0x7c] sm:$0xf]  ;;  %v1995_v34 = vld [vmem:[#allocation11 + $0x84] sm:$0xf0] }
  0x71   : >> { %831 = vmatpush.bf16.msra.mxu2 %v2026_v10  ;;  %v1994_v33 = vor.u32 %v2274_v31, %v1993_v30  ;;  %v2001_v35 = vld [vmem:[#allocation11 + $0x80] sm:$0xf]  ;;  %v2275_v36 = vld [vmem:[#allocation11 + $0x88] sm:$0xf0]  ;;  %v1998_v37 = vor.u32 %v2273_v32, %v1995_v34  ;;  %v2270_v41 = vld [vmem:[#allocation11 + $0x64] sm:$0xf] }
  0x72   : >> { %v2528_v11 = vpop.eup %2527  ;;  %806 = vmatpush.bf16.msra.mxu0 %v2006_v24  ;;  %v2002_v38 = vor.u32 %v2275_v36, %v2001_v35  ;;  %v1981_v39 = vld [vmem:[#allocation11 + $0x60] sm:$0xf]  ;;  %v2271_v40 = vld [vmem:[#allocation11 + $0x68] sm:$0xf0]  ;;  %v1983_v43 = vld [vmem:[#allocation11 + $0x6c] sm:$0xf0] }
  0x73   : >> { %v604_v12 = vmul.f32 128.0, %v2528_v11  ;;  %vm608_vm0 = vweird.f32 %v2528_v11  ;;  %819 = vmatpush.bf16.msra.mxu1 %v2010_v28  ;;  %v1982_v42 = vor.u32 %v2271_v40, %v1981_v39  ;;  %v1989_v44 = vld [vmem:[#allocation11 + $0x68] sm:$0xf]  ;;  %v2272_v45 = vld [vmem:[#allocation11 + $0x70] sm:$0xf0]  ;;  %v1986_v46 = vor.u32 %v2270_v41, %v1983_v43  ;;  %s846_s12 = sshra.s32 %s1930_s20, 3 }
  0x74   : >> { %v1990_v47 = vor.u32 %v2272_v45, %v1989_v44  ;;  %v1969_v48 = vld [vmem:[#allocation11 + $0x48] sm:$0xf]  ;;  %v2268_v49 = vld [vmem:[#allocation11 + $0x50] sm:$0xf0]  ;;  %v2267_v50 = vld [vmem:[#allocation11 + $0x4c] sm:$0xf] }
  0x75   : >> { %v605_v13 = vsub.f32 1.0, %v604_v12  ;;  %832 = vmatpush.bf16.msra.mxu2 %v2014_v29  ;;  %v1970_v51 = vor.u32 %v2268_v49, %v1969_v48  ;;  %v1971_v52 = vld [vmem:[#allocation11 + $0x54] sm:$0xf0]  ;;  %v1977_v53 = vld [vmem:[#allocation11 + $0x50] sm:$0xf]  ;;  %s2027_s28 = sshll.u32 %s846_s12, 2 }
  0x76   : >> { %807 = vmatpush.bf16.msra.mxu0 %v1994_v33  ;;  %v2269_v54 = vld [vmem:[#allocation11 + $0x58] sm:$0xf0]  ;;  %v1974_v55 = vor.u32 %v2267_v50, %v1971_v52  ;;  %v1957_v57 = vld [vmem:[#allocation11 + $0x30] sm:$0xf]  ;;  %v2264_v59 = vld [vmem:[#allocation11 + $0x34] sm:$0xf] }
  0x77   : >> { %v606_v14 = vmul.f32 %v2528_v11, %v605_v13  ;;  %820 = vmatpush.bf16.msra.mxu1 %v1998_v37  ;;  %v1978_v56 = vor.u32 %v2269_v54, %v1977_v53  ;;  %v2265_v58 = vld [vmem:[#allocation11 + $0x38] sm:$0xf0]  ;;  %v1959_v61 = vld [vmem:[#allocation11 + $0x3c] sm:$0xf0]  ;;  %v1965_v62 = vld [vmem:[#allocation11 + $0x38] sm:$0xf] }
  0x78   : >> { %v1958_v60 = vor.u32 %v2265_v58, %v1957_v57  ;;  %v2266_v63 = vld [vmem:[#allocation11 + $0x40] sm:$0xf0]  ;;  %v1945_v2 = vld [vmem:[#allocation11 + $0x18] sm:$0xf]  ;;  %v2261_v4 = vld [vmem:[#allocation11 + $0x1c] sm:$0xf] }
  0x79   : >> { %v607_v15 = vadd.f32 %v2528_v11, %v606_v14  ;;  %833 = vmatpush.bf16.msra.mxu2 %v2002_v38  ;;  %v1966_v1 = vor.u32 %v2266_v63, %v1965_v62  ;;  %v2262_v3 = vld [vmem:[#allocation11 + $0x20] sm:$0xf0]  ;;  %v1947_v6 = vld [vmem:[#allocation11 + $0x24] sm:$0xf0]  ;;  %v1953_v7 = vld [vmem:[#allocation11 + $0x20] sm:$0xf] }
  0x7a   : >> { %808 = vmatpush.bf16.msra.mxu0 %v1982_v42  ;;  %v1946_v5 = vor.u32 %v2262_v3, %v1945_v2  ;;  %v2263_v8 = vld [vmem:[#allocation11 + $0x28] sm:$0xf0]  ;;  %v1950_v9 = vor.u32 %v2261_v4, %v1947_v6  ;;  %v2258_v13 = vld [vmem:[#allocation11 + $0x4] sm:$0xf]  ;;  %v2525_v31 = vld [vmem:[#allocation8] ss:$0 sm:$0xff] }
  0x7b   : >> { %v3255_v16 = vsel %vm608_vm0, %v2528_v11, %v607_v15  ;;  %821 = vmatpush.bf16.msra.mxu1 %v1986_v46  ;;  %v1954_v10 = vor.u32 %v2263_v8, %v1953_v7  ;;  %v1933_v11 = vld [vmem:[#allocation11] sm:$0xf]  ;;  %v2259_v12 = vld [vmem:[#allocation11 + $0x8] sm:$0xf0]  ;;  %v1935_v15 = vld [vmem:[#allocation11 + $0xc] sm:$0xf0] }
  0x7c   : >> { %v1934_v14 = vor.u32 %v2259_v12, %v1933_v11  ;;  %v2526_v34 = vld [vmem:[#allocation10] ss:$0 sm:$0xff]  ;;  %vm850_vm4 = vcmask 257024   ;;  %s3269_s13 = scalar_lea.vmem [#allocation2], %s2027_s28  ;;  %s2961_s22 = smov 32  }
  0x7d   : >> { %834 = vmatpush.bf16.msra.mxu2 %v1990_v47  ;;  %v669_v37 = vld [vmem:[%s3491_s7] sm:$0x7]  ;;  %s2962_s0 = smov 96   ;;  %s856_s2 = scalar_lea.vmem [#allocation3], %s2027_s28 }
  0x7e   : >> { %809 = vmatpush.bf16.msra.mxu0 %v1970_v51  ;;  %v671_v38 = vperm.slane %v669_v37, 0  ;;  %v672_v39 = vperm.slane %v669_v37, 1  ;;  %v673_v44 = vperm.slane %v669_v37, 2  ;;  %s859_s11 = scalar_lea.vmem [#allocation4], %s2027_s28  ;;  %s2963_s20 = smov 64  }
  0x7f   : >> { %822 = vmatpush.bf16.msra.mxu1 %v1974_v55  ;;  %s595_s21 = sadd.s32 1, %s2945_s21  }
  0x80   : >> { %p592_p1 = scmp.ge.s32.totalorder %s595_s21, 2  }
  0x81   : >> { %835 = vmatpush.bf16.msra.mxu2 %v1978_v56 }
  0x82   : >> { %810 = vmatpush.bf16.msra.mxu0 %v1958_v60 }
  0x85   : >> { %836 = vmatpush.bf16.msra.mxu2 %v1966_v1 }
  0x86   : >> { %811 = vmatpush.bf16.msra.mxu0 %v1946_v5 }
  0x89   : >> { %837 = vmatpush.bf16.msra.mxu2 %v1954_v10 }
  0x8a   : >> { %812 = vmatpush.bf16.msra.mxu0 %v1934_v14 }
  0xe1   : >> { %v602_v17 = vpop.xlane.xlu0 %601 }
  0xe2   : >> { %v610_v18 = vmul.f32 %v3255_v16, %v602_v17  ;;  %v1941_v17 = vld [vmem:[#allocation11 + $0x8] sm:$0xf] }
  0xe4   : >> { %v3258_v19 = vsub.f32 %v598_v0, %v610_v18  ;;  %v1962_v0 = vor.u32 %v2264_v59, %v1959_v61  ;;  %v2260_v18 = vld [vmem:[#allocation11 + $0x10] sm:$0xf0] }
  0xe5   : >> { %v1942_v21 = vor.u32 %v2260_v18, %v1941_v17 }
  0xe6   : >> { %v612_v20 = vmul.f32 %v3258_v19, %v3258_v19  ;;  %823 = vmatpush.bf16.msra.mxu1 %v1962_v0 }
  0xe7   : >> { %838 = vmatpush.bf16.msra.mxu2 %v1942_v21 }
  0xe8   : >> { %613 = vadd.xlane.f32.xlu0 %v612_v20  ;;  %v1938_v20 = vor.u32 %v2258_v13, %v1935_v15 }
  0xea   : >> { %824 = vmatpush.bf16.msra.mxu1 %v1950_v9 }
  0xee   : >> { %825 = vmatpush.bf16.msra.mxu1 %v1938_v20 }
 0x15b   : >> { %v614_v22 = vpop.xlane.xlu0 %613 }
 0x15c   : >> { %v615_v23 = vmul.f32 %v614_v22, %v3255_v16 }
 0x15e   : >> { %v616_v24 = vadd.f32 1e-05, %v615_v23 }
 0x160   : >> { %2529 = vrsqrt.f32 %v616_v24  ;;  %vm623_vm2 = vweird.f32 %v616_v24 }
 0x166   : >> { %v2530_v25 = vpop.eup %2529 }
 0x167   : >> { %v618_v26 = vmul.f32 %v2530_v25, %v616_v24  ;;  %vm624_vm1 = vweird.f32 %v2530_v25 }
 0x168   : >> { %vm625_vm3 = vmor %vm623_vm2, %vm624_vm1 }
 0x169   : >> { %v619_v27 = vmul.f32 %v2530_v25, %v618_v26 }
 0x16b   : >> { %v620_v28 = vmul.f32 0.5, %v619_v27 }
 0x16d   : >> { %v621_v29 = vsub.f32 1.5, %v620_v28 }
 0x16f   : >> { %v622_v30 = vmul.f32 %v2530_v25, %v621_v29 }
 0x171   : >> { %v626_v32 = vsel %vm625_vm3, %v2530_v25, %v622_v30 }
 0x172   : >> { %v627_v33 = vmul.f32 %v626_v32, %v3258_v19 }
 0x174   : >> { %v631_v35 = vmul.f32 %v2525_v31, %v627_v33 }
 0x176   : >> { %v635_v36 = vadd.f32 %v2526_v34, %v631_v35 }
 0x178   : >> { %v636_v16 = vpack.c.bf16 %v635_v36, %v635_v36 }
 0x17a   : >> { %813 = vmatmul.bf16.vlgmr.msra.gmra.mxu0 %v636_v16  ;;  %826 = vmatmul.bf16.vlgmr.msra.gmra.mxu1 %v636_v16 }
 0x17b   : >> { %839 = vmatmul.bf16.vlgmr.msra.gmra.mxu2 %v636_v16 }
 0x1f7   : >> { %v814_v40 = vpop.f32.mrf.mxu0  ;;  %v827_v41 = vpop.f32.mrf.mxu1 }
 0x1f8   : >> { %v815_v42 = vadd.f32 %v814_v40, %v671_v38  ;;  %v828_v19 = vadd.f32 %v827_v41, %v672_v39 }
 0x1fa   : >> { %v844_v43 = vpack.c.bf16 %v828_v19, %v815_v42 }
 0x1fc   : >> { %851 = vst.msk [vmem:[%s3269_s13] sm:$0xf] %vm850_vm4, %v844_v43  ;;  %v853_v45 = vrot.slane %v844_v43, 4  ;;  %898 = vrot.lane.b32.xlu2 %v844_v43, %s2961_s22  ;;  %861 = vrot.lane.b32.xlu1 %v844_v43, %s2962_s0 }
 0x1fe   : >> { %857 = vst.msk [vmem:[%s856_s2] sm:$0xf] %vm850_vm4, %v853_v45  ;;  %v840_v46 = vpop.f32.mrf.mxu2 }
 0x1ff   : >> { %v841_v47 = vadd.f32 %v840_v46, %v673_v44  ;;  %v816_v48 = vpop.f32.mrf.mxu0  ;;  %v829_v49 = vpop.f32.mrf.mxu1 }
 0x201   : >> { %v845_v50 = vpack.c.bf16 %v841_v47, %v841_v47 }
 0x203   : >> { %860 = vst.msk [vmem:[%s859_s11] sm:$0xf] %vm850_vm4, %v845_v50  ;;  %892 = vrot.lane.b32.xlu0 %v845_v50, %s2963_s20 }
 0x204   : >> { %874 = vrot.lane.b32.xlu2 %v845_v50, %s2962_s0  ;;  %880 = vrot.lane.b32.xlu1 %v844_v43, %s2963_s20 }
 0x206   : >> { %v842_v51 = vpop.f32.mrf.mxu2 }
 0x20c   : >> { %910 = vrot.lane.b32.xlu1 %v845_v50, %s2961_s22 }
 0x256   : >> { %v899_v52 = vpop.permute.xlu2 %898 }
 0x257   : >> { %2043 = vst.msk [vmem:[%s3269_s13 + $0x18] sm:$0xf] %vm850_vm4, %v899_v52  ;;  %v905_v53 = vrot.slane %v899_v52, 4 }
 0x259   : >> { %2045 = vst.msk [vmem:[%s856_s2 + $0x18] sm:$0xf] %vm850_vm4, %v905_v53 }
 0x25e   : >> { %v875_v54 = vpop.permute.xlu2 %874 }
 0x25f   : >> { %2035 = vst.msk [vmem:[%s859_s11 + $0x8] sm:$0xf] %vm850_vm4, %v875_v54 }
 0x26e   : >> { %v862_v55 = vpop.permute.xlu1 %861 }
 0x26f   : >> { %2031 = vst.msk [vmem:[%s3269_s13 + $0x8] sm:$0xf] %vm850_vm4, %v862_v55  ;;  %v868_v56 = vrot.slane %v862_v55, 4 }
 0x271   : >> { %2033 = vst.msk [vmem:[%s856_s2 + $0x8] sm:$0xf] %vm850_vm4, %v868_v56 }
 0x275   : >> { %v893_v57 = vpop.permute.xlu0 %892 }
 0x276   : >> { %2041 = vst.msk [vmem:[%s859_s11 + $0x10] sm:$0xf] %vm850_vm4, %v893_v57  ;;  %v881_v58 = vpop.permute.xlu1 %880 }
 0x277   : >> { %2037 = vst.msk [vmem:[%s3269_s13 + $0x10] sm:$0xf] %vm850_vm4, %v881_v58  ;;  %v887_v59 = vrot.slane %v881_v58, 4 }
 0x279   : >> { %2039 = vst.msk [vmem:[%s856_s2 + $0x10] sm:$0xf] %vm850_vm4, %v887_v59 }
 0x27b   : > { %594 = sbr.rel (!%p592_p1) target bundleno = 107 (0x6b), region = 171 }
 0x27e   : >> { %v911_v60 = vpop.permute.xlu1 %910 }
 0x27f   : >> { %2047 = vst.msk [vmem:[%s859_s11 + $0x18] sm:$0xf] %vm850_vm4, %v911_v60 }
 0x280 PF: > { %v2282_v61 = vld [vmem:[#allocation3] sm:$0xff]  ;;  %s3492_s24 = sld [smem:[#allocation26_spill]]  ;;  %vm940_vm5 = vcmask 261120   ;;  %v2284_v62 = vld [vmem:[#allocation3 + $0x10] sm:$0xff]  ;;  %v2285_v63 = vld [vmem:[#allocation3 + $0x18] sm:$0xff]  ;;  %vm1032_vm6 = vcmask 130048  }
 0x281   : > { %v2283_v0 = vld [vmem:[#allocation3 + $0x8] sm:$0xff]  ;;  %v945_v1 = vsel %vm940_vm5, %v2282_v61, 0  ;;  %v993_v2 = vsel %vm940_vm5, %v2284_v62, 0  ;;  %v1017_v3 = vsel %vm940_vm5, %v2285_v63, 0  ;;  %s2964_s12 = smov 32   ;;  %s2965_s28 = smov 64  }
 0x282   : > { %954 = vmatpush.bf16.xpose.msra.mxu1 %v945_v1  ;;  %1002 = vmatpush.bf16.xpose.msra.mxu2 %v993_v2  ;;  %v969_v4 = vsel %vm940_vm5, %v2283_v0, 0  ;;  %s2966_s13 = smov 96   ;;  %v2297_v2 = vld [vmem:[#allocation13 + $0x38] sm:$0xff]  ;;  %vm1190_vm7 = vcmask 523264   ;;  %vm1192_vm8 = vcmask 785408   ;;  %s3493_s0 = sld [smem:[#allocation37_spill]] }
 0x283   : > { %1026 = vmatpush.bf16.xpose.msra.mxu3 %v1017_v3  ;;  %v2296_v3 = vld [vmem:[#allocation13 + $0x30] sm:$0xff]  ;;  %s3494_s20 = sld [smem:[#allocation38_spill]] }
 0x284   : > { %s3498_s11 = sld [smem:[#allocation43_spill]] }
 0x286   : > { %s2048_s8 = sshll.u32 %s3492_s24, 3  ;;  %v2288_v23 = vld [vmem:[#allocation4 + $0x10] sm:$0xff]  ;;  %v2289_v24 = vld [vmem:[#allocation4 + $0x18] sm:$0xff]  ;;  %v2287_v25 = vld [vmem:[#allocation4 + $0x8] sm:$0xff] }
 0x287   : > { %s919_s4 = sshra.s32 %s2048_s8, 3  ;;  %v2286_v26 = vld [vmem:[#allocation4] sm:$0xff]  ;;  %s917_s22 = scalar_lea.vmem %s506_s19, %s2048_s8 [#allocation5] }
 0x288   : > { %s2049_s7 = sshll.u32 %s919_s4, 2  ;;  %1097 = vmatpush.bf16.msra.mxu0 %v2286_v26  ;;  %s3497_s19 = sld [smem:[#allocation42_spill]] }
 0x289   : > { %s922_s21 = scalar_lea.vmem [#allocation2], %s2049_s7  ;;  %s3495_s7 = sld [smem:[#allocation40_spill]] }
 0x28a   : > { %978 = vmatpush.bf16.xpose.msrb.mxu1 %v969_v4  ;;  %v923_v5 = vld [vmem:[%s922_s21] sm:$0xf]  ;;  %v925_v6 = vld [vmem:[%s922_s21 + $0x10] sm:$0xf]  ;;  %v926_v7 = vld [vmem:[%s922_s21 + $0x18] sm:$0xf]  ;;  %1141 = vmatpush.bf16.msrb.mxu2 %v2288_v23 }
 0x28b   : > { %2054 = vmatmul.msk.bf16.vlgmr.msra.gmra.mxu1 %vm940_vm5, %v923_v5  ;;  %2064 = vmatmul.msk.bf16.vlgmr.msra.gmra.mxu2 %vm940_vm5, %v925_v6  ;;  %v924_v8 = vld [vmem:[%s922_s21 + $0x8] sm:$0xf]  ;;  %v2295_v4 = vld [vmem:[#allocation13 + $0x28] sm:$0xff]  ;;  %v2293_v6 = vld [vmem:[#allocation13 + $0x18] sm:$0xff]  ;;  %s3496_s21 = sld [smem:[#allocation27_spill]]  ;;  %s1708_s8 = sshll.u32 %s584_s9, 4  ;;  %s1709_s8 = int_to_ptr.vmem [resolvable:$true] %s1708_s8 }
 0x28c   : > { %2069 = vmatmul.msk.bf16.vlgmr.msra.gmra.mxu3 %vm940_vm5, %v926_v7  ;;  %1263 = vmatpush.bf16.msrb.mxu0 %v2297_v2  ;;  %v2294_v5 = vld [vmem:[#allocation13 + $0x20] sm:$0xff]  ;;  %v2292_v7 = vld [vmem:[#allocation13 + $0x10] sm:$0xff] }
 0x28d   : > { %1163 = vmatpush.bf16.msrb.mxu3 %v2289_v24  ;;  %v918_v23 = vld [vmem:[%s917_s22] sm:$0xff] }
 0x290   : > { %1264 = vmatpush.bf16.msrb.mxu0 %v2296_v3  ;;  %v2140_v3 = vld [vmem:[#allocation16 + $0x20] sm:$0xf] }
 0x292   : > { %1119 = vmatpush.bf16.msra.mxu1 %v2287_v25 }
 0x294   : > { %1265 = vmatpush.bf16.msrb.mxu0 %v2295_v4  ;;  %v2303_v4 = vld [vmem:[#allocation16 + $0x24] sm:$0xf0] }
 0x298   : > { %1266 = vmatpush.bf16.msrb.mxu0 %v2294_v5  ;;  %v2302_v5 = vld [vmem:[#allocation16 + $0x24] sm:$0xf] }
 0x29b   : > { %2059 = vmatmul.msk.bf16.vlgmr.msrb.gmra.mxu1 %vm940_vm5, %v924_v8  ;;  %v2291_v8 = vld [vmem:[#allocation13 + $0x8] sm:$0xff] }
 0x29c   : > { %1267 = vmatpush.bf16.msrb.mxu0 %v2293_v6  ;;  %v2141_v6 = vor.u32 %v2303_v4, %v2140_v3 }
 0x2a0   : > { %1268 = vmatpush.bf16.msrb.mxu0 %v2292_v7  ;;  %v2142_v7 = vld [vmem:[#allocation16 + $0x28] sm:$0xf0] }
 0x2a4   : > { %1269 = vmatpush.bf16.msrb.mxu0 %v2291_v8  ;;  %v2145_v8 = vor.u32 %v2302_v5, %v2142_v7 }
 0x308   : > { %v956_v9 = vpop.f32.mrf.mxu1 }
 0x309   : > { %v1033_v22 = vsel %vm1032_vm6, %v956_v9, -inf }
 0x30e   : > { %v1004_v10 = vpop.f32.mrf.mxu2 }
 0x30f   : > { %v1028_v11 = vpop.f32.mrf.mxu3  ;;  %v1039_v12 = vsel %vm1032_vm6, %v1004_v10, -inf }
 0x310   : > { %1040 = vmax.xlane.f32.xlu0 %v1039_v12  ;;  %v958_v13 = vpop.f32.mrf.mxu1  ;;  %v1042_v14 = vsel %vm1032_vm6, %v1028_v11, -inf }
 0x316   : > { %v1006_v15 = vpop.f32.mrf.mxu2 }
 0x317   : > { %v1030_v17 = vpop.f32.mrf.mxu3 }
 0x318   : > { %1043 = vmax.xlane.f32.xlu0 %v1042_v14  ;;  %v980_v18 = vpop.f32.mrf.mxu1 }
 0x319   : > { %v1036_v20 = vsel %vm1032_vm6, %v980_v18, -inf }
 0x31a   : > { %1037 = vmax.xlane.f32.xlu1 %v1036_v20 }
 0x320   : > { %v982_v21 = vpop.f32.mrf.mxu1 }
 0x322   : > { %1034 = vmax.xlane.f32.xlu1 %v1033_v22  ;;  %v2531_v22 = vld [vmem:[#allocation14] ss:$0 sm:$0xff] }
 0x383   : > { %v1041_v27 = vpop.xlane.xlu0 %1040 }
 0x384   : > { %v1047_v28 = vsub.f32 %v1004_v10, %v1041_v27 }
 0x386   : > { %v1053_v29 = vmul.f32 1.442695, %v1047_v28  ;;  %v2967_v28 = vmov 128.0  }
 0x388   : > { %2535 = vpow2.f32 %v1053_v29  ;;  %v2180_v29 = vld [vmem:[#allocation16 + $0x70] sm:$0xf] }
 0x38b   : > { %v1044_v30 = vpop.xlane.xlu0 %1043 }
 0x38c   : > { %v1048_v31 = vsub.f32 %v1028_v11, %v1044_v30  ;;  %v2313_v30 = vld [vmem:[#allocation16 + $0x74] sm:$0xf0] }
 0x38d   : > { %v1038_v32 = vpop.xlane.xlu1 %1037 }
 0x38e   : > { %v2536_v33 = vpop.eup %2535  ;;  %v1055_v34 = vmul.f32 1.442695, %v1048_v31  ;;  %v1046_v35 = vsub.f32 %v980_v18, %v1038_v32  ;;  %v2312_v31 = vld [vmem:[#allocation16 + $0x74] sm:$0xf]  ;;  %v2181_v32 = vor.u32 %v2313_v30, %v2180_v29 }
 0x38f   : > { %v1071_v36 = vpack.c.bf16 %v2536_v33, %v2536_v33  ;;  %v1063_v46 = vsel %vm1032_vm6, %v2536_v33, 0.0  ;;  %v2182_v33 = vld [vmem:[#allocation16 + $0x78] sm:$0xf0] }
 0x390   : > { %2537 = vpow2.f32 %v1055_v34  ;;  %v1051_v16 = vmul.f32 1.442695, %v1046_v35  ;;  %v2185_v34 = vor.u32 %v2312_v31, %v2182_v33  ;;  %1417 = vmatpush.bf16.msrb.mxu1 %v2181_v32  ;;  %v2532_v33 = vld [vmem:[%s3493_s0] ss:$0 sm:$0xff] }
 0x391   : > { %2084 = vmatmul.msk.bf16.vlgmr.msrb.gmra.mxu2 %vm1032_vm6, %v1071_v36 }
 0x392   : > { %2539 = vpow2.f32 %v1051_v16  ;;  %1430 = vmatpush.bf16.msra.mxu2 %v2185_v34 }
 0x395   : > { %v1035_v37 = vpop.xlane.xlu1 %1034 }
 0x396   : > { %v2538_v38 = vpop.eup %2537  ;;  %v1045_v39 = vsub.f32 %v956_v9, %v1035_v37  ;;  %v2290_v9 = vld [vmem:[#allocation13] sm:$0xff] }
 0x397   : > { %v1066_v40 = vsel %vm1032_vm6, %v2538_v38, 0.0  ;;  %v1072_v41 = vpack.c.bf16 %v2538_v38, %v2538_v38  ;;  %1270 = vmatpush.bf16.msrb.mxu0 %v2290_v9  ;;  %v2132_v9 = vld [vmem:[#allocation16 + $0x10] sm:$0xf] }
 0x398   : > { %v2540_v42 = vpop.eup %2539  ;;  %v1049_v19 = vmul.f32 1.442695, %v1045_v39  ;;  %1067 = vadd.xlane.f32.xlu0 %v1066_v40 }
 0x399   : > { %v1070_v43 = vpack.c.bf16 %v2540_v42, %v2540_v42  ;;  %2089 = vmatmul.msk.bf16.vlgmr.msrb.gmra.mxu3 %vm1032_vm6, %v1072_v41  ;;  %v1060_v44 = vsel %vm1032_vm6, %v2540_v42, 0.0 }
 0x39a   : > { %2541 = vpow2.f32 %v1049_v19  ;;  %1061 = vadd.xlane.f32.xlu2 %v1060_v44  ;;  %v2311_v44 = vld [vmem:[#allocation16 + $0x64] sm:$0xf0] }
 0x39b   : > { %2079 = vmatmul.msk.bf16.vlgmr.msra.gmra.mxu1 %vm1032_vm6, %v1070_v43  ;;  %v2172_v43 = vld [vmem:[#allocation16 + $0x60] sm:$0xf] }
 0x3a0   : > { %v2542_v45 = vpop.eup %2541 }
 0x3a1   : > { %v1057_v47 = vsel %vm1032_vm6, %v2542_v45, 0.0  ;;  %v1069_v48 = vpack.c.bf16 %v2542_v45, %v2542_v45  ;;  %v2310_v45 = vld [vmem:[#allocation16 + $0x64] sm:$0xf] }
 0x3a2   : > { %1064 = vadd.xlane.f32.xlu2 %v1063_v46  ;;  %1058 = vadd.xlane.f32.xlu1 %v1057_v47  ;;  %v2173_v46 = vor.u32 %v2311_v44, %v2172_v43  ;;  %v2174_v47 = vld [vmem:[#allocation16 + $0x68] sm:$0xf0]  ;;  %v2329_v43 = vld [vmem:[#allocation17 + $0x78] sm:$0xff] }
 0x3a3   : > { %2074 = vmatmul.msk.bf16.vlgmr.msra.gmra.mxu0 %vm1032_vm6, %v1069_v48  ;;  %v2177_v48 = vor.u32 %v2310_v45, %v2174_v47  ;;  %v2319_v45 = vld [vmem:[#allocation17 + $0x28] sm:$0xff] }
 0x3a4   : > { %1418 = vmatpush.bf16.msrb.mxu1 %v2173_v46  ;;  %1678 = vmatpush.bf16.msra.mxu0 %v2329_v43 }
 0x3a5   : > { %1431 = vmatpush.bf16.msra.mxu2 %v2177_v48  ;;  %v2328_v48 = vld [vmem:[#allocation17 + $0x70] sm:$0xff] }
 0x3a8   : > { %1679 = vmatpush.bf16.msra.mxu0 %v2328_v48 }
 0x40b   : > { %v1068_v50 = vpop.xlane.xlu0 %1067 }
 0x40d   : > { %v1062_v49 = vpop.xlane.xlu2 %1061 }
 0x40e   : > { %2543 = vrcp.f32 %v1062_v49  ;;  %v2164_v49 = vld [vmem:[#allocation16 + $0x50] sm:$0xf] }
 0x40f   : > { %2545 = vrcp.f32 %v1068_v50  ;;  %v2309_v50 = vld [vmem:[#allocation16 + $0x54] sm:$0xf0] }
 0x414   : > { %v1143_v51 = vpop.f32.mrf.mxu2  ;;  %v2544_v53 = vpop.eup %2543 }
 0x415   : > { %v1065_v52 = vpop.xlane.xlu2 %1064  ;;  %v2546_v56 = vpop.eup %2545 }
 0x416   : > { %2547 = vrcp.f32 %v1065_v52  ;;  %v1059_v10 = vpop.xlane.xlu1 %1058  ;;  %v2165_v52 = vor.u32 %v2309_v50, %v2164_v49  ;;  %v2318_v50 = vld [vmem:[#allocation17 + $0x20] sm:$0xff] }
 0x417   : > { %2549 = vrcp.f32 %v1059_v10  ;;  %v2301_v10 = vld [vmem:[#allocation16 + $0x14] sm:$0xf0] }
 0x418   : > { %v1121_v54 = vpop.f32.mrf.mxu1  ;;  %2551 = vrcp.f32 %v2967_v28  ;;  %1419 = vmatpush.bf16.msrb.mxu1 %v2165_v52 }
 0x419   : > { %v1174_v55 = vmul.f32 %v2544_v53, %v1121_v54  ;;  %v2166_v53 = vld [vmem:[#allocation16 + $0x58] sm:$0xf0] }
 0x41b   : > { %1178 = vrot.lane.b32.xlu2 %v1174_v55, %s2964_s12  ;;  %v2156_v55 = vld [vmem:[#allocation16 + $0x40] sm:$0xf]  ;;  %s2253_s12 = sshll.u32 %s3496_s21, 1 }
 0x41c   : > { %v2548_v57 = vpop.eup %2547  ;;  %v1145_v58 = vpop.f32.mrf.mxu2 }
 0x41d   : > { %v1165_v59 = vpop.f32.mrf.mxu3  ;;  %v1175_v61 = vmul.f32 %v2548_v57, %v1143_v51  ;;  %v2550_v11 = vpop.eup %2549  ;;  %v2308_v51 = vld [vmem:[#allocation16 + $0x54] sm:$0xf]  ;;  %v2306_v57 = vld [vmem:[#allocation16 + $0x44] sm:$0xf] }
 0x41e   : > { %v1176_v60 = vmul.f32 %v2546_v56, %v1165_v59  ;;  %v2552_v35 = vpop.eup %2551  ;;  %v2169_v54 = vor.u32 %v2308_v51, %v2166_v53  ;;  %v2307_v56 = vld [vmem:[#allocation16 + $0x44] sm:$0xf0]  ;;  %v2158_v59 = vld [vmem:[#allocation16 + $0x48] sm:$0xf0] }
 0x41f   : > { %1182 = vrot.lane.b32.xlu0 %v1175_v61, %s2965_s28  ;;  %v1282_v36 = vmul.f32 128.0, %v2552_v35  ;;  %vm1286_vm9 = vweird.f32 %v2552_v35  ;;  %v2157_v58 = vor.u32 %v2307_v56, %v2156_v55  ;;  %v2148_v61 = vld [vmem:[#allocation16 + $0x30] sm:$0xf]  ;;  %s1704_s28 = sadd.s32 %s3492_s24, %s2253_s12  ;;  %s1694_s24 = scalar_lea.sflag [#allocation7], %s582_s5 }
 0x420   : > { %1186 = vrot.lane.b32.xlu1 %v1176_v60, %s2966_s13  ;;  %v1099_v62 = vpop.f32.mrf.mxu0  ;;  %v1123_v63 = vpop.f32.mrf.mxu1  ;;  %1432 = vmatpush.bf16.msra.mxu2 %v2169_v54  ;;  %v2161_v60 = vor.u32 %v2306_v57, %v2158_v59  ;;  %v2327_v54 = vld [vmem:[#allocation17 + $0x68] sm:$0xff]  ;;  %s2254_s13 = sshll.u32 %s1704_s28, 3 }
 0x421   : > { %v1173_v13 = vmul.f32 %v2550_v11, %v1099_v62  ;;  %v1283_v16 = vsub.f32 1.0, %v1282_v36  ;;  %1420 = vmatpush.bf16.msrb.mxu1 %v2157_v58  ;;  %v2305_v62 = vld [vmem:[#allocation16 + $0x34] sm:$0xf0]  ;;  %v2304_v63 = vld [vmem:[#allocation16 + $0x34] sm:$0xf]  ;;  %1680 = vmatpush.bf16.msra.mxu0 %v2327_v54 }
 0x422   : > { %v2300_v11 = vld [vmem:[#allocation16 + $0x14] sm:$0xf]  ;;  %v2533_v36 = vld [vmem:[%s3494_s20] ss:$0 sm:$0xff]  ;;  %s1706_s20 = scalar_lea.hbm %s3498_s11, %s2254_s13  ;;  %s2819_s13 = scalar_lea.hbm %s3498_s11, 32 }
 0x423   : > { %v1284_v37 = vmul.f32 %v2552_v35, %v1283_v16  ;;  %v2317_v58 = vld [vmem:[#allocation17 + $0x18] sm:$0xff]  ;;  %s1710_s4 = sshll.u32 %s1706_s20, 4  ;;  %s1711_s4 = int_to_ptr.hbm [resolvable:$true] %s1710_s4 }
 0x424   : > { %1433 = vmatpush.bf16.msra.mxu2 %v2161_v60 }
 0x425   : > { %v1167_v0 = vpop.f32.mrf.mxu3  ;;  %v1285_v38 = vadd.f32 %v2552_v35, %v1284_v37 }
 0x426   : > { %v2149_v0 = vor.u32 %v2305_v62, %v2148_v61  ;;  %v2326_v62 = vld [vmem:[#allocation17 + $0x60] sm:$0xff] }
 0x427   : > { %v3321_v39 = vsel %vm1286_vm9, %v2552_v35, %v1285_v38  ;;  %1681 = vmatpush.bf16.msra.mxu0 %v2326_v62 }
 0x428   : > { %v1101_v1 = vpop.f32.mrf.mxu0  ;;  %1421 = vmatpush.bf16.msrb.mxu1 %v2149_v0 }
 0x429   : > { %v2150_v1 = vld [vmem:[#allocation16 + $0x38] sm:$0xf0] }
 0x42a   : > { %v2153_v2 = vor.u32 %v2304_v63, %v2150_v1 }
 0x42c   : > { %1434 = vmatpush.bf16.msra.mxu2 %v2153_v2  ;;  %1422 = vmatpush.bf16.msrb.mxu1 %v2141_v6  ;;  %v2316_v2 = vld [vmem:[#allocation17 + $0x10] sm:$0xff]  ;;  %v2325_v6 = vld [vmem:[#allocation17 + $0x58] sm:$0xff] }
 0x42d   : > { %1682 = vmatpush.bf16.msra.mxu0 %v2325_v6 }
 0x430   : > { %1435 = vmatpush.bf16.msra.mxu2 %v2145_v8 }
 0x475   : > { %v1179_v12 = vpop.permute.xlu2 %1178 }
 0x476   : > { %v1189_v14 = vsel %vm940_vm5, %v1173_v13, %v1179_v12  ;;  %v2133_v12 = vor.u32 %v2301_v10, %v2132_v9  ;;  %v2134_v13 = vld [vmem:[#allocation16 + $0x18] sm:$0xf0] }
 0x478   : > { %1423 = vmatpush.bf16.msrb.mxu1 %v2133_v12 }
 0x491   : > { %v1183_v15 = vpop.permute.xlu0 %1182 }
 0x492   : > { %v1187_v17 = vpop.permute.xlu1 %1186  ;;  %v1191_v18 = vsel %vm1190_vm7, %v1189_v14, %v1183_v15  ;;  %v2124_v14 = vld [vmem:[#allocation16] sm:$0xf]  ;;  %v2299_v15 = vld [vmem:[#allocation16 + $0x4] sm:$0xf0] }
 0x493   : > { %v1193_v20 = vsel %vm1192_vm8, %v1191_v18, %v1187_v17  ;;  %v2137_v17 = vor.u32 %v2300_v11, %v2134_v13  ;;  %v2298_v18 = vld [vmem:[#allocation16 + $0x4] sm:$0xf]  ;;  %v2315_v11 = vld [vmem:[#allocation17 + $0x8] sm:$0xff] }
 0x494   : > { %v1194_v21 = vpack.c.bf16 %v1193_v20, %v1193_v20  ;;  %v2126_v20 = vld [vmem:[#allocation16 + $0x8] sm:$0xf0] }
 0x495   : > { %1436 = vmatpush.bf16.msra.mxu2 %v2137_v17 }
 0x496   : > { %1271 = vmatmul.bf16.vlgmr.msrb.gmra.mxu0 %v1194_v21  ;;  %v2125_v21 = vor.u32 %v2299_v15, %v2124_v14  ;;  %v2324_v15 = vld [vmem:[#allocation17 + $0x50] sm:$0xff] }
 0x497   : > { %1683 = vmatpush.bf16.msra.mxu0 %v2324_v15 }
 0x498   : > { %1424 = vmatpush.bf16.msrb.mxu1 %v2125_v21 }
 0x513   : > { %v1272_v24 = vpop.f32.mrf.mxu0 }
 0x514   : > { %v1273_v25 = vadd.f32 %v2531_v22, %v1272_v24  ;;  %v2129_v22 = vor.u32 %v2298_v18, %v2126_v20 }
 0x516   : > { %v3318_v26 = vadd.f32 %v1273_v25, %v918_v23  ;;  %1437 = vmatpush.bf16.msra.mxu2 %v2129_v22  ;;  %v2314_v22 = vld [vmem:[#allocation17] sm:$0xff] }
 0x518   : > { %1279 = vadd.xlane.f32.xlu2 %v3318_v26 }
 0x51b   : > { %v1274_v27 = vpop.f32.mrf.mxu0 }
 0x58b   : > { %v1280_v40 = vpop.xlane.xlu2 %1279 }
 0x58c   : > { %v1288_v41 = vmul.f32 %v3321_v39, %v1280_v40  ;;  %v1331_v40 = vld [vmem:[%s3495_s7] sm:$0x3]  ;;  %s2813_s7 = sshra.s32 %s1711_s4, 4  ;;  %s2814_s7 = int_to_ptr.hbm [resolvable:$true] %s2813_s7 }
 0x58d   : > { %v1334_v47 = vperm.slane %v1331_v40, 1  ;;  %s2815_s21 = scalar_lea.hbm %s2814_s7, 8  ;;  %p2820_p0 = scmp.lt.s32.totalorder %s2814_s7, %s3498_s11 }
 0x58e   : > { %v3325_v42 = vsub.f32 %v3318_v26, %v1288_v41  ;;  %v1333_v41 = vperm.slane %v1331_v40, 0  ;;  %p2816_p9 = scmp.ne.s32.totalorder %s2814_s7, %s2815_s21  ;;  %p2821_p2 = scmp.lt.s32.totalorder %s2819_s13, %s2815_s21 }
 0x590   : > { %v1290_v19 = vmul.f32 %v3325_v42, %v3325_v42  ;;  %p2817_p12 = pnand %p2816_p9, %p3187_p6  ;;  %p2822_p4 = por %p2821_p2, %p2820_p0 }
 0x592   : > { %1291 = vadd.xlane.f32.xlu0 %v1290_v19  ;;  %v2320_v19 = vld [vmem:[#allocation17 + $0x30] sm:$0xff]  ;;  %p2818_p13 = pneg %p2817_p12 }
 0x594   : > { %p2823_p5 = pnand %p2822_p4, %p2818_p13 }
 0x605   : > { %v1292_v23 = vpop.xlane.xlu0 %1291 }
 0x606   : > { %v1293_v24 = vmul.f32 %v1292_v23, %v3321_v39  ;;  %v2321_v39 = vld [vmem:[#allocation17 + $0x38] sm:$0xff] }
 0x607   : > { %1665 = vmatpush.bf16.msra.mxu3 %v2321_v39 }
 0x608   : > { %v1294_v25 = vadd.f32 1e-05, %v1293_v24 }
 0x60a   : > { %2553 = vrsqrt.f32 %v1294_v25  ;;  %vm1301_vm11 = vweird.f32 %v1294_v25 }
 0x60b   : > { %1666 = vmatpush.bf16.msra.mxu3 %v2320_v19 }
 0x60f   : > { %1667 = vmatpush.bf16.msra.mxu3 %v2319_v45 }
 0x610   : > { %v2554_v27 = vpop.eup %2553 }
 0x611   : > { %v1296_v28 = vmul.f32 %v2554_v27, %v1294_v25  ;;  %vm1302_vm10 = vweird.f32 %v2554_v27 }
 0x612   : > { %vm1303_vm12 = vmor %vm1301_vm11, %vm1302_vm10 }
 0x613   : > { %v1297_v29 = vmul.f32 %v2554_v27, %v1296_v28  ;;  %1668 = vmatpush.bf16.msra.mxu3 %v2318_v50 }
 0x615   : > { %v1298_v30 = vmul.f32 0.5, %v1297_v29 }
 0x617   : > { %v1299_v31 = vsub.f32 1.5, %v1298_v30  ;;  %1669 = vmatpush.bf16.msra.mxu3 %v2317_v58 }
 0x619   : > { %v1300_v32 = vmul.f32 %v2554_v27, %v1299_v31 }
 0x61b   : > { %v1304_v34 = vsel %vm1303_vm12, %v2554_v27, %v1300_v32  ;;  %1670 = vmatpush.bf16.msra.mxu3 %v2316_v2  ;;  %v2323_v27 = vld [vmem:[#allocation17 + $0x48] sm:$0xff] }
 0x61c   : > { %v1305_v35 = vmul.f32 %v1304_v34, %v3325_v42  ;;  %1684 = vmatpush.bf16.msra.mxu0 %v2323_v27  ;;  %v2322_v34 = vld [vmem:[#allocation17 + $0x40] sm:$0xff] }
 0x61e   : > { %v1309_v16 = vmul.f32 %v2532_v33, %v1305_v35 }
 0x61f   : > { %1671 = vmatpush.bf16.msra.mxu3 %v2315_v11 }
 0x620   : > { %v1313_v37 = vadd.f32 %v2533_v36, %v1309_v16  ;;  %1685 = vmatpush.bf16.msra.mxu0 %v2322_v34 }
 0x622   : > { %v1314_v38 = vpack.c.bf16 %v1313_v37, %v1313_v37 }
 0x623   : > { %1672 = vmatpush.bf16.msra.mxu3 %v2314_v22 }
 0x624   : > { %1425 = vmatmul.bf16.vlgmr.msrb.gmra.mxu1 %v1314_v38  ;;  %1438 = vmatmul.bf16.vlgmr.msra.gmra.mxu2 %v1314_v38 }
 0x6a1   : > { %v1426_v42 = vpop.f32.mrf.mxu1 }
 0x6a2   : > { %v3340_v44 = vadd.f32 %v1426_v42, %v1333_v41 }
 0x6a4   : > { %v3343_v46 = vmul.f32 0.70710677, %v3340_v44 }
 0x6a6   : > { %v1447_v49 = vmul.f32 %v3343_v46, %v3343_v46 }
 0x6a7   : > { %v1439_v51 = vpop.f32.mrf.mxu2 }
 0x6a8   : > { %v3347_v52 = vmin.f32 %v1447_v49, 16.0  ;;  %v3349_v53 = vadd.f32 %v1439_v51, %v1334_v47 }
 0x6a9   : > { %v1428_v55 = vpop.f32.mrf.mxu1 }
 0x6aa   : > { %v1449_v56 = vmul.f32 2.1237322e-06, %v3347_v52  ;;  %v1460_v57 = vmul.f32 3.8918573e-05, %v3347_v52  ;;  %v3354_v59 = vmul.f32 0.70710677, %v3349_v53 }
 0x6ab   : > { %v1444_v15 = vmul.f32 0.5, %v3349_v53 }
 0x6ac   : > { %v1450_v60 = vadd.f32 0.00028619796, %v1449_v56  ;;  %v1461_v61 = vadd.f32 0.001143296, %v1460_v57  ;;  %v1487_v63 = vmul.f32 %v3354_v59, %v3354_v59 }
 0x6ae   : > { %v1451_v0 = vmul.f32 %v1450_v60, %v3347_v52  ;;  %v1462_v1 = vmul.f32 %v1461_v61, %v3347_v52  ;;  %v1488_v3 = vmin.f32 %v1487_v63, 16.0 }
 0x6af   : > { %v1441_v4 = vpop.f32.mrf.mxu2 }
 0x6b0   : > { %v1463_v5 = vadd.f32 0.014752088, %v1462_v1  ;;  %v1452_v7 = vadd.f32 0.0036580483, %v1451_v0  ;;  %v1489_v8 = vmul.f32 2.1237322e-06, %v1488_v3 }
 0x6b1   : > { %v1500_v9 = vmul.f32 3.8918573e-05, %v1488_v3 }
 0x6b2   : > { %v1464_v10 = vmul.f32 %v1463_v5, %v3347_v52  ;;  %v1490_v12 = vadd.f32 0.00028619796, %v1489_v8  ;;  %v1453_v17 = vmul.f32 %v1452_v7, %v3347_v52  ;;  %v1443_v7 = vmul.f32 0.5, %v3340_v44 }
 0x6b3   : > { %v1501_v13 = vadd.f32 0.001143296, %v1500_v9 }
 0x6b4   : > { %v1465_v14 = vadd.f32 0.112945676, %v1464_v10  ;;  %v1491_v18 = vmul.f32 %v1490_v12, %v1488_v3  ;;  %v1454_v28 = vadd.f32 0.05243302, %v1453_v17 }
 0x6b5   : > { %v1502_v20 = vmul.f32 %v1501_v13, %v1488_v3 }
 0x6b6   : > { %v1466_v21 = vmul.f32 %v1465_v14, %v3347_v52  ;;  %v1492_v25 = vadd.f32 0.0036580483, %v1491_v18  ;;  %v1455_v35 = vmul.f32 %v1454_v28, %v3347_v52 }
 0x6b7   : > { %v1503_v23 = vadd.f32 0.014752088, %v1502_v20 }
 0x6b8   : > { %v1467_v24 = vadd.f32 0.4994258, %v1466_v21  ;;  %v1493_v33 = vmul.f32 %v1492_v25, %v1488_v3  ;;  %v1456_v38 = vadd.f32 0.18741608, %v1455_v35 }
 0x6b9   : > { %v1504_v29 = vmul.f32 %v1503_v23, %v1488_v3 }
 0x6ba   : > { %v1468_v30 = vmul.f32 %v1467_v24, %v3347_v52  ;;  %v1494_v37 = vadd.f32 0.05243302, %v1493_v33  ;;  %v1457_v43 = vmul.f32 %v1456_v38, %v3347_v52 }
 0x6bb   : > { %v1505_v31 = vadd.f32 0.112945676, %v1504_v29 }
 0x6bc   : > { %v1469_v32 = vadd.f32 1.0, %v1468_v30  ;;  %v1495_v19 = vmul.f32 %v1494_v37, %v1488_v3  ;;  %v1458_v49 = vadd.f32 1.1283791, %v1457_v43 }
 0x6bd   : > { %v1506_v36 = vmul.f32 %v1505_v31, %v1488_v3 }
 0x6be   : > { %2555 = vrcp.f32 %v1469_v32  ;;  %v1481_v47 = vand.u32 2147483648, %v1469_v32  ;;  %v1496_v48 = vadd.f32 0.18741608, %v1495_v19  ;;  %v1479_v51 = vand.u32 2147483647, %v1469_v32 }
 0x6bf   : > { %v1507_v16 = vadd.f32 0.4994258, %v1506_v36  ;;  %vm1475_vm14 = vweird.f32 %v1469_v32  ;;  %v1459_v60 = vmul.f32 %v1458_v49, %v3343_v46 }
 0x6c0   : > { %v1482_v56 = vor.u32 1.1754944e-38, %v1481_v47  ;;  %v1497_v57 = vmul.f32 %v1496_v48, %v1488_v3  ;;  %vm1480_vm0 = vcmp.eq.f32.partialorder %v1479_v51, 8.507059e+37 }
 0x6c1   : > { %v1508_v39 = vmul.f32 %v1507_v16, %v1488_v3 }
 0x6c2   : > { %v1498_v1 = vadd.f32 1.1283791, %v1497_v57 }
 0x6c3   : > { %v1509_v40 = vadd.f32 1.0, %v1508_v39 }
 0x6c4   : > { %v2556_v41 = vpop.eup %2555  ;;  %v1499_v46 = vmul.f32 %v1498_v1, %v3354_v59  ;;  %v2534_v59 = vld [vmem:[%s3497_s19] ss:$0 sm:$0xff] }
 0x6c5   : > { %v1471_v42 = vmul.f32 %v2556_v41, %v1469_v32  ;;  %2557 = vrcp.f32 %v1509_v40  ;;  %vm1476_vm13 = vweird.f32 %v2556_v41  ;;  %v1521_v0 = vand.u32 2147483648, %v1509_v40 }
 0x6c6   : > { %vm1477_vm15 = vmor %vm1475_vm14, %vm1476_vm13  ;;  %v1519_v4 = vand.u32 2147483647, %v1509_v40  ;;  %vm1515_vm2 = vweird.f32 %v1509_v40 }
 0x6c7   : > { %v1472_v45 = vsub.f32 1.0, %v1471_v42  ;;  %v1522_v3 = vor.u32 1.1754944e-38, %v1521_v0 }
 0x6c8   : > { %vm1520_vm4 = vcmp.eq.f32.partialorder %v1519_v4, 8.507059e+37 }
 0x6c9   : > { %v1473_v50 = vmul.f32 %v2556_v41, %v1472_v45 }
 0x6cb   : > { %v2558_v54 = vpop.eup %2557  ;;  %v1474_v55 = vadd.f32 %v2556_v41, %v1473_v50 }
 0x6cc   : > { %v1511_v58 = vmul.f32 %v2558_v54, %v1509_v40  ;;  %vm1516_vm1 = vweird.f32 %v2558_v54 }
 0x6cd   : > { %v1478_v61 = vsel %vm1477_vm15, %v2556_v41, %v1474_v55  ;;  %vm1517_vm3 = vmor %vm1515_vm2, %vm1516_vm1 }
 0x6ce   : > { %v1483_v52 = vsel %vm1480_vm0, %v1482_v56, %v1478_v61  ;;  %v1512_v62 = vsub.f32 1.0, %v1511_v58 }
 0x6cf   : > { %v1484_v63 = vmul.f32 %v1483_v52, %v1459_v60 }
 0x6d0   : > { %v1513_v2 = vmul.f32 %v2558_v54, %v1512_v62 }
 0x6d1   : > { %v2186_v5 = vclamps-f32 %v1484_v63, 1.0 }
 0x6d2   : > { %v1514_v6 = vadd.f32 %v2558_v54, %v1513_v2 }
 0x6d3   : > { %v1527_v8 = vadd.f32 1.0, %v2186_v5 }
 0x6d4   : > { %v1518_v9 = vsel %vm1517_vm3, %v2558_v54, %v1514_v6 }
 0x6d5   : > { %v1529_v10 = vmul.f32 %v1527_v8, %v1443_v7  ;;  %v1523_v11 = vsel %vm1520_vm4, %v1522_v3, %v1518_v9 }
 0x6d6   : > { %v1524_v12 = vmul.f32 %v1523_v11, %v1499_v46 }
 0x6d7   : > { %v1531_v13 = vpack.c.bf16 %v1529_v10, %v1529_v10 }
 0x6d8   : > { %v2187_v14 = vclamps-f32 %v1524_v12, 1.0 }
 0x6d9   : > { %1673 = vmatmul.bf16.vlgmr.msra.gmra.mxu3 %v1531_v13 }
 0x6da   : > { %v1528_v17 = vadd.f32 1.0, %v2187_v14 }
 0x6dc   : > { %v1530_v44 = vmul.f32 %v1528_v17, %v1444_v15 }
 0x6de   : > { %v1532_v18 = vpack.c.bf16 %v1530_v44, %v1530_v44 }
 0x6e0   : > { %1686 = vmatmul.bf16.vlgmr.msra.gmra.mxu0 %v1532_v18 }
 0x75c   : > { %v1674_v20 = vpop.f32.mrf.mxu3 }
 0x75d   : > { %v1675_v53 = vadd.f32 %v2534_v59, %v1674_v20  ;;  %v1687_v21 = vpop.f32.mrf.mxu0 }
 0x75f   : > { %v1688_v22 = vadd.f32 %v1687_v21, %v1675_v53 }
 0x761   : > { %v1691_v23 = vadd.f32 %v1688_v22, %v3318_v26 }
 0x763   : > { %1692 = vst [vmem:[%s584_s9] sm:$0xff] %v1691_v23 }
 0x764   : > { %v1676_v24 = vpop.f32.mrf.mxu3 }
 0x765   : > { %2826 = shalt.err (!%p2823_p5)
}
 0x766   : > { %2360 = dma.vmem_to_hbm [thread:$0]  (%p3187_p6), %s1709_s8, 128, %s1711_s4, %s1694_s24   ;;  %v1689_v26 = vpop.f32.mrf.mxu0 }
 0x767 PF: > { %p2407_p7 = scmp.ge.s32.totalorder %s2941_s18, 2  ;;  %s1722_s5 = sand.u32 1, %s2901_s25  }
 0x768   : > { %s1723_s6 = scalar_lea.sflag [#allocation7], %s1722_s5 }
 0x769   : > { %p2389_p8 = pnand %p2407_p7, %p3200_p10 }
 0x76b   : > { %p2390_p11 = pneg %p2389_p8 }
 0x76d   : > { %2896 = dma.done.wait (%p2390_p11), %s1723_s6, 128  }
 0x76e   : > { %2898 = vsyncadd (%p2390_p11), %s1723_s6, 4294967168  ;;  %s33_s18 = sadd.s32 1, %s2941_s18   ;;  %s3499_s23 = smov %s3512_s14 }
 0x76f   : > { %p30_p3 = scmp.ge.s32.totalorder %s33_s18, 6   ;;  %s3500_s9 = sld [smem:[#allocation29_spill]] }
 0x770   : > { %s3501_s25 = smov %s2905_s26  ;;  %s3502_s26 = smov %s2909_s27 }
 0x771   : > { %s3503_s27 = smov %s3195_s10  ;;  %s3504_s28 = smov %s2917_s29 }
 0x772   : > { %s3505_s29 = smov %s2921_s30  ;;  %s3506_s30 = smov %s3192_s1 }
 0x773   : > { %s3507_s14 = smov %s2933_s16  ;;  %s3508_s15 = smov %s2937_s17 }
 0x774   : > { %s3509_s16 = smov %s3499_s23  ;;  %32 = sbr.rel (!%p30_p3) target bundleno = 28 (0x1c), region = 182 }
 0x775   : > { %s3510_s17 = smov %s3500_s9 }
 0x779   :  { %1729 = vsyncpa [#allocation6], 1 }
 0x77a   :  { %1731 = vsyncpa [#allocation6 + $0x1], 1 }
 0x77b   :  { %1732 = vsyncpa [#allocation9], 1 }
 0x77c   :  { %1733 = vsyncpa [#allocation12], 1 }
 0x77d   :  { %1734 = vsyncpa [#allocation15], 1 }
 0x77e   :  { %1735 = vsyncpa [#allocation18], 1 }
 0x77f   :  { %1736 = vsyncpa [#allocation7], 1 }
 0x780   :  { %1738 = vsyncpa [#allocation7 + $0x1], 1 }

</bundles_post_ra>
